<compile_context>
chip_gen: v7x
topology: tpu7x:2x2x1
jax: 0.10.0
libtpu: 0.0.40
codegen_flags: <defaults>
</compile_context>

<pallas_src>
import math
import jax
import jax.numpy as jnp
from jax.experimental import pallas as pl
from jax.experimental.pallas import tpu as pltpu


def _cdiv(a, b):
    return -(-a // b)


def _round_up(x, m):
    return ((x + m - 1) // m) * m


def potential_kernel(x_ref, w1_ref, b1_ref, w2_ref, b2_ref, w3_ref, b3_ref,
                     out_ref):
    """Feature-major 3-layer MLP for one batch tile (weights resident in VMEM).

    x_ref : [D,  tb] mm_dtype   state tile, batch on the lane axis
    w1_ref: [H1, D ] mm_dtype   torch layout (fan_out, fan_in)
    b1_ref: [H1, 1 ] f32
    w2_ref: [H2, H1] mm_dtype
    b2_ref: [H2, 1 ] f32
    w3_ref: [H2, 1 ] f32
    b3_ref: [1,  1 ] f32
    out   : [1,  tb] f32        lane-dense q row for this tile
    """
    mm_dtype = w1_ref.dtype                                   # f32 or bf16

    # layer 1 + ReLU: MXU matmul, f32 accumulate; bias/ReLU in f32.
    h1 = jnp.dot(w1_ref[...], x_ref[...],
                 preferred_element_type=jnp.float32)          # [H1, tb]
    h1 = jnp.maximum(h1 + b1_ref[...], 0.0)

    # layer 2 + ReLU: MXU matmul, f32 accumulate; output dim 300 on sublanes.
    h2 = jnp.dot(w2_ref[...], h1.astype(mm_dtype),
                 preferred_element_type=jnp.float32)          # [H2, tb]
    h2 = jnp.maximum(h2 + b2_ref[...], 0.0)

    # layer 3 (300 -> 1): VPU multiply + sublane reduce (avoids an M=1 MXU
    # matmul); result is already a lane-dense [1, tb] row.
    q = jnp.sum(h2 * w3_ref[...], axis=0, keepdims=True) + b3_ref[...]
    out_ref[...] = q.astype(out_ref.dtype)


# Per-step batch-tile cap (lane axis); multiple of 128.  At 2048 rows the f32
# intermediates are ~8-10 MB — inside the 32 MiB scoped VMEM limit below on
# every generation (including v7x's 64 MiB physical VMEM).
_MAX_TILE_B = 2048


def potential_forward(state, params, *, tile_b=None, use_bf16=True):
    """state: [B, state_dim] float32 -> [B, 1] float32."""
    w1, b1, w2, b2, w3, b3 = (params["w1"], params["b1"], params["w2"],
                              params["b2"], params["w3"], params["b3"])
    B, D = state.shape
    H1, H2 = w1.shape[1], w2.shape[1]

    # Matmul operand dtype (accumulation stays f32 inside the kernel).
    mm_dtype = jnp.bfloat16 if use_bf16 else jnp.float32

    # Feature-major operands: batch lives on the lane axis everywhere.
    w1_t = w1.T.astype(mm_dtype)                       # [H1, D]  (torch layout)
    w2_t = w2.T.astype(mm_dtype)                       # [H2, H1]
    b1_c = b1.reshape(H1, 1).astype(jnp.float32)       # [H1, 1]
    b2_c = b2.reshape(H2, 1).astype(jnp.float32)       # [H2, 1]
    w3_c = w3.reshape(H2, 1).astype(jnp.float32)       # [H2, 1]
    b3_c = b3.reshape(1, 1).astype(jnp.float32)        # [1, 1]

    # ----- batch tiling (lane axis: multiples of 128) -----------------------
    if tile_b is None:
        # >= 2 grid steps whenever the batch allows it (both v7x TensorCores
        # via the "parallel" axis); tile grows with B up to _MAX_TILE_B so the
        # padding waste stays bounded and v5e/v6e get big tiles.
        target_tiles = max(2, _cdiv(B, _MAX_TILE_B)) if B > 128 else 1
        tile_b = min(_MAX_TILE_B, _round_up(_cdiv(B, target_tiles), 128))
    tile_b = _round_up(max(int(tile_b), 128), 128)
    num_tiles = _cdiv(B, tile_b)
    B_pad = num_tiles * tile_b

    state_t = state.T.astype(mm_dtype)                 # [D, B], lanes = batch
    if B_pad != B:
        state_t = jnp.pad(state_t, ((0, 0), (0, B_pad - B)))

    out = pl.pallas_call(
        potential_kernel,
        out_shape=jax.ShapeDtypeStruct((1, B_pad), jnp.float32),
        grid_spec=pltpu.PrefetchScalarGridSpec(
            num_scalar_prefetch=0,
            grid=(num_tiles,),
            in_specs=[
                pl.BlockSpec((D, tile_b), lambda i: (0, i)),   # state tile
                # Resident weights / biases (constant index map -> one DMA).
                pl.BlockSpec((H1, D),  lambda i: (0, 0)),      # w1
                pl.BlockSpec((H1, 1),  lambda i: (0, 0)),      # b1
                pl.BlockSpec((H2, H1), lambda i: (0, 0)),      # w2
                pl.BlockSpec((H2, 1),  lambda i: (0, 0)),      # b2
                pl.BlockSpec((H2, 1),  lambda i: (0, 0)),      # w3 column
                pl.BlockSpec((1, 1),   lambda i: (0, 0)),      # b3
            ],
            out_specs=pl.BlockSpec((1, tile_b), lambda i: (0, i)),
        ),
        compiler_params=pltpu.CompilerParams(
            dimension_semantics=("parallel",),
            # Covers the 2048-row f32 intermediates; above v5e's 16 MiB
            # scoped default, equal to the v6e/v7x default.
            vmem_limit_bytes=32 * 1024 * 1024,
        ),
    )(state_t, w1_t, b1_c, w2_t, b2_c, w3_c, b3_c)

    # out[0, j] is q for (padded) batch row j.
    return out.reshape(B_pad, 1)[:B]


def init_potential_params(key, state_dim):
    """PyTorch nn.Linear default init: U(-1/sqrt(fan_in), 1/sqrt(fan_in))."""
    dims = [(state_dim, 400), (400, 300), (300, 1)]
    params = {}
    for idx, (fan_in, fan_out) in enumerate(dims, start=1):
        key, kw, kb = jax.random.split(key, 3)
        bound = 1.0 / math.sqrt(fan_in)
        params[f"w{idx}"] = jax.random.uniform(          # stored as W_torch.T
            kw, (fan_in, fan_out), jnp.float32, -bound, bound)
        params[f"b{idx}"] = jax.random.uniform(
            kb, (1, fan_out), jnp.float32, -bound, bound)
    return params


def potential_reference(state, params):
    """Plain-JAX reference for correctness check."""
    h = jnp.maximum(state @ params["w1"] + params["b1"], 0.0)
    h = jnp.maximum(h @ params["w2"] + params["b2"], 0.0)
    return h @ params["w3"] + params["b3"]


if __name__ == "__main__":
    key = jax.random.PRNGKey(0)
    kp, kx1, kx2 = jax.random.split(key, 3)

    state_dim = 17   # e.g. MuJoCo-style observation dim
    params = init_potential_params(kp, state_dim)

    # --- test 1: small batch, single tile, exact f32 path -------------------
    state_a = jax.random.normal(kx1, (8, state_dim), jnp.float32)
    out_a = jax.block_until_ready(
        potential_forward(state_a, params, use_bf16=False))
    ref_a = potential_reference(state_a, params)
    assert out_a.shape == (8, 1), out_a.shape
    assert jnp.allclose(out_a, ref_a, atol=1e-4, rtol=1e-4), (
        float(jnp.max(jnp.abs(out_a - ref_a))))

    # --- test 2: ragged batch -> 2-step grid + batch padding, f32 -----------
    state_b = jax.random.normal(kx2, (200, state_dim), jnp.float32)
    out_b = jax.block_until_ready(
        potential_forward(state_b, params, use_bf16=False))
    ref_b = potential_reference(state_b, params)
    assert out_b.shape == (200, 1), out_b.shape
    assert jnp.allclose(out_b, ref_b, atol=1e-4, rtol=1e-4), (
        float(jnp.max(jnp.abs(out_b - ref_b))))

    # --- test 3: default bf16 MXU-operand path (f32 accumulation) -----------
    out_c = jax.block_until_ready(potential_forward(state_b, params))
    assert out_c.shape == (200, 1), out_c.shape
    assert jnp.allclose(out_c, ref_b, atol=5e-2, rtol=5e-2), (
        float(jnp.max(jnp.abs(out_c - ref_b))))

    print("KERNEL_OK")
</pallas_src>

<mosaic_0001>
module attributes {stable_mosaic.version = 11 : i64} {
  func.func @potential_kernel(%arg0: i32, %arg1: memref<17x128xf32, #tpu.memory_space<vmem>>, %arg2: memref<400x17xf32, #tpu.memory_space<vmem>>, %arg3: memref<400x1xf32, #tpu.memory_space<vmem>>, %arg4: memref<300x400xf32, #tpu.memory_space<vmem>>, %arg5: memref<300x1xf32, #tpu.memory_space<vmem>>, %arg6: memref<300x1xf32, #tpu.memory_space<vmem>>, %arg7: memref<1x1xf32, #tpu.memory_space<vmem>>, %arg8: memref<1x128xf32, #tpu.memory_space<vmem>>) attributes {dimension_semantics = [#tpu.dimension_semantics<parallel>], iteration_bounds = array<i64: 1>, scalar_prefetch = 0 : i64, scratch_operands = 0 : i64, tpu.core_type = #tpu.core_type<tc>, window_params = [{transform_indices = @transform_0, window_bounds = array<i64: 17, 128>}, {pipeline_mode = #tpu.pipeline_mode<synchronous>, transform_indices = @transform_1, window_bounds = array<i64: 400, 17>}, {pipeline_mode = #tpu.pipeline_mode<synchronous>, transform_indices = @transform_2, window_bounds = array<i64: 400, 1>}, {pipeline_mode = #tpu.pipeline_mode<synchronous>, transform_indices = @transform_3, window_bounds = array<i64: 300, 400>}, {pipeline_mode = #tpu.pipeline_mode<synchronous>, transform_indices = @transform_4, window_bounds = array<i64: 300, 1>}, {pipeline_mode = #tpu.pipeline_mode<synchronous>, transform_indices = @transform_5, window_bounds = array<i64: 300, 1>}, {pipeline_mode = #tpu.pipeline_mode<synchronous>, transform_indices = @transform_6, window_bounds = array<i64: 1, 1>}, {transform_indices = @transform_7, window_bounds = array<i64: 1, 128>}]} {
    %c0 = arith.constant 0 : index
    %c0_0 = arith.constant 0 : index
    %0 = vector.load %arg2[%c0, %c0_0] : memref<400x17xf32, #tpu.memory_space<vmem>>, vector<400x17xf32>
    %c0_1 = arith.constant 0 : index
    %c0_2 = arith.constant 0 : index
    %1 = vector.load %arg1[%c0_1, %c0_2] : memref<17x128xf32, #tpu.memory_space<vmem>>, vector<17x128xf32>
    %cst = arith.constant dense<0.000000e+00> : vector<400x128xf32>
    %2 = tpu.matmul %0, %1, %cst {dimension_numbers = #tpu.dot_dimension_numbers<[1], [0], [0], [1], [0, 0, 1, 1], [], []>} : vector<400x17xf32>, vector<17x128xf32>, vector<400x128xf32> -> vector<400x128xf32>
    %c0_3 = arith.constant 0 : index
    %c0_4 = arith.constant 0 : index
    %3 = vector.load %arg3[%c0_3, %c0_4] : memref<400x1xf32, #tpu.memory_space<vmem>>, vector<400x1xf32>
    %4 = vector.broadcast %3 : vector<400x1xf32> to vector<400x128xf32>
    %5 = arith.addf %2, %4 : vector<400x128xf32>
    %cst_5 = arith.constant 0.000000e+00 : f32
    %6 = vector.broadcast %cst_5 : f32 to vector<400x128xf32>
    %7 = arith.maximumf %5, %6 : vector<400x128xf32>
    %c0_6 = arith.constant 0 : index
    %c0_7 = arith.constant 0 : index
    %8 = vector.load %arg4[%c0_6, %c0_7] : memref<300x400xf32, #tpu.memory_space<vmem>>, vector<300x400xf32>
    %cst_8 = arith.constant dense<0.000000e+00> : vector<300x128xf32>
    %9 = tpu.matmul %8, %7, %cst_8 {dimension_numbers = #tpu.dot_dimension_numbers<[1], [0], [0], [1], [0, 0, 1, 1], [], []>} : vector<300x400xf32>, vector<400x128xf32>, vector<300x128xf32> -> vector<300x128xf32>
    %c0_9 = arith.constant 0 : index
    %c0_10 = arith.constant 0 : index
    %10 = vector.load %arg5[%c0_9, %c0_10] : memref<300x1xf32, #tpu.memory_space<vmem>>, vector<300x1xf32>
    %11 = vector.broadcast %10 : vector<300x1xf32> to vector<300x128xf32>
    %12 = arith.addf %9, %11 : vector<300x128xf32>
    %cst_11 = arith.constant 0.000000e+00 : f32
    %13 = vector.broadcast %cst_11 : f32 to vector<300x128xf32>
    %14 = arith.maximumf %12, %13 : vector<300x128xf32>
    %c0_12 = arith.constant 0 : index
    %c0_13 = arith.constant 0 : index
    %15 = vector.load %arg6[%c0_12, %c0_13] : memref<300x1xf32, #tpu.memory_space<vmem>>, vector<300x1xf32>
    %16 = vector.broadcast %15 : vector<300x1xf32> to vector<300x128xf32>
    %17 = arith.mulf %14, %16 : vector<300x128xf32>
    %cst_14 = arith.constant dense<0.000000e+00> : vector<128xf32>
    %18 = vector.multi_reduction <add>, %17, %cst_14 [0] : vector<300x128xf32> to vector<128xf32>
    %19 = vector.shape_cast %18 : vector<128xf32> to vector<1x128xf32>
    %c0_15 = arith.constant 0 : index
    %c0_16 = arith.constant 0 : index
    %20 = vector.load %arg7[%c0_15, %c0_16] : memref<1x1xf32, #tpu.memory_space<vmem>>, vector<1x1xf32>
    %21 = vector.broadcast %20 : vector<1x1xf32> to vector<1x128xf32>
    %22 = arith.addf %19, %21 : vector<1x128xf32>
    %c0_17 = arith.constant 0 : index
    %c0_18 = arith.constant 0 : index
    %23 = vector.load %arg8[%c0_17, %c0_18] : memref<1x128xf32, #tpu.memory_space<vmem>>, vector<1x128xf32>
    tpu.vector_store %arg8[%c0_17, %c0_18], %22 {strides = array<i32>} : memref<1x128xf32, #tpu.memory_space<vmem>>, vector<1x128xf32>,
    return
  }
  func.func @transform_0(%arg0: i32) -> (i32, i32) {
    %c0_i32 = arith.constant 0 : i32
    %c0_i32_0 = arith.constant 0 : i32
    return %c0_i32, %arg0 : i32, i32
  }
  func.func @transform_1(%arg0: i32) -> (i32, i32) {
    %c0_i32 = arith.constant 0 : i32
    %c0_i32_0 = arith.constant 0 : i32
    %c0_i32_1 = arith.constant 0 : i32
    return %c0_i32, %c0_i32_0 : i32, i32
  }
  func.func @transform_2(%arg0: i32) -> (i32, i32) {
    %c0_i32 = arith.constant 0 : i32
    %c0_i32_0 = arith.constant 0 : i32
    %c0_i32_1 = arith.constant 0 : i32
    return %c0_i32, %c0_i32_0 : i32, i32
  }
  func.func @transform_3(%arg0: i32) -> (i32, i32) {
    %c0_i32 = arith.constant 0 : i32
    %c0_i32_0 = arith.constant 0 : i32
    %c0_i32_1 = arith.constant 0 : i32
    return %c0_i32, %c0_i32_0 : i32, i32
  }
  func.func @transform_4(%arg0: i32) -> (i32, i32) {
    %c0_i32 = arith.constant 0 : i32
    %c0_i32_0 = arith.constant 0 : i32
    %c0_i32_1 = arith.constant 0 : i32
    return %c0_i32, %c0_i32_0 : i32, i32
  }
  func.func @transform_5(%arg0: i32) -> (i32, i32) {
    %c0_i32 = arith.constant 0 : i32
    %c0_i32_0 = arith.constant 0 : i32
    %c0_i32_1 = arith.constant 0 : i32
    return %c0_i32, %c0_i32_0 : i32, i32
  }
  func.func @transform_6(%arg0: i32) -> (i32, i32) {
    %c0_i32 = arith.constant 0 : i32
    %c0_i32_0 = arith.constant 0 : i32
    %c0_i32_1 = arith.constant 0 : i32
    return %c0_i32, %c0_i32_0 : i32, i32
  }
  func.func @transform_7(%arg0: i32) -> (i32, i32) {
    %c0_i32 = arith.constant 0 : i32
    %c0_i32_0 = arith.constant 0 : i32
    return %c0_i32, %arg0 : i32, i32
  }
}

</mosaic_0001>

<bundles_post_ra>
// kernel: tpu_custom_call.1
= control target key start
LH: loop header
LB: loop body
LE: loop exit
PB: predicated region body
PF: predicated region fallthrough
CT: control target
= control target key end

     0   :  { %s4165_s0 = inlined_call_operand.vmem [shape: f32[17,128], index: 0, kind: input, shape index: {}]   ;;  %s4166_s1 = inlined_call_operand.vmem [shape: f32[400,17], index: 1, kind: input, shape index: {}]   ;;  %s4167_s2 = inlined_call_operand.vmem [shape: f32[400,1], index: 2, kind: input, shape index: {}]   ;;  %s4168_s3 = inlined_call_operand.vmem [shape: f32[300,400], index: 3, kind: input, shape index: {}]   ;;  %s4169_s4 = inlined_call_operand.vmem [shape: f32[300,1], index: 4, kind: input, shape index: {}]   ;;  %s4170_s5 = inlined_call_operand.vmem [shape: f32[300,1], index: 5, kind: input, shape index: {}]   ;;  %s4171_s6 = inlined_call_operand.<no memory space> [shape: f32[1,1], index: 6, kind: input, shape index: {}]   ;;  %s4172_s7 = inlined_call_operand.hbm [shape: f32[1,128], index: 7, kind: output, shape index: {}]  }
   0x1   :  { %v12_v0 = vstv %s4171_s6 }
   0x2   :  { %13 = vst [vmem:[#allocation2] sm:$0x1] %v12_v0 }
   0x3   :  { %v84_v1 = vld [vmem:[%s4167_s2 + $0x10] sm:$0xff]  ;;  %v82_v2 = vld [vmem:[%s4167_s2] sm:$0xff]  ;;  %vm382_vm0 = vcmask 138240   ;;  %v2713_v4 = vmov 0   ;;  %v80_v5 = vld [vmem:[%s4165_s0 + $0x8] sm:$0xff]  ;;  %vm533_vm1 = vcmask 1040384  }
   0x4   :  { %v79_v3 = vld [vmem:[%s4165_s0] sm:$0xff]  ;;  %2688 = vset.pattern.permute.xlu1 %v2713_v4  ;;  %2687 = vset.pattern.permute.xlu0 %v2713_v4  ;;  %v85_v8 = vld [vmem:[%s4167_s2 + $0x18] sm:$0xff]  ;;  %v83_v9 = vld [vmem:[%s4167_s2 + $0x8] sm:$0xff] }
   0x5   :  { %144 = vperm.xlu1 %2688, %v84_v1   ;;  %134 = vperm.xlu0 %2687, %v82_v2   ;;  %v2505_v6 = vpack.c.bf16 %v80_v5, %v79_v3  ;;  %v29_v7 = vld [vmem:[%s4166_s1] sm:$0xff]  ;;  %v81_v10 = vld [vmem:[%s4165_s0 + $0x10] sm:$0x1]  ;;  %v30_v11 = vld [vmem:[%s4166_s1 + $0x8] sm:$0xff] }
   0x6   :  { %2430 = vmatprep.mubr.msk.f32.mxu0 %vm382_vm0, %v29_v7  ;;  %v87_v12 = vld [vmem:[%s4167_s2 + $0x28] sm:$0xff]  ;;  %v86_v13 = vld [vmem:[%s4167_s2 + $0x20] sm:$0xff]  ;;  %v31_v14 = vld [vmem:[%s4166_s1 + $0x10] sm:$0xff] }
   0x7   :  { %2506 = vmatprep.subr.bf16.mxu0 %v2505_v6  ;;  %v32_v15 = vld [vmem:[%s4166_s1 + $0x18] sm:$0xff]  ;;  %v88_v17 = vld [vmem:[%s4167_s2 + $0x30] sm:$0xff]  ;;  %v33_v18 = vld [vmem:[%s4166_s1 + $0x20] sm:$0xff] }
   0x8   :  { %2508 = vmatpush3.bf16.msra.mxu0 %v2505_v6  ;;  %v89_v16 = vld [vmem:[%s4167_s2 + $0x38] sm:$0xff]  ;;  %v34_v19 = vld [vmem:[%s4166_s1 + $0x28] sm:$0xff]  ;;  %v90_v21 = vld [vmem:[%s4167_s2 + $0x40] sm:$0xff] }
   0x9   :  { %149 = vperm.xlu1 %2688, %v85_v8   ;;  %139 = vperm.xlu0 %2687, %v83_v9   ;;  %v91_v20 = vld [vmem:[%s4167_s2 + $0x48] sm:$0xff]  ;;  %v35_v22 = vld [vmem:[%s4166_s1 + $0x30] sm:$0xff]  ;;  %v36_v23 = vld [vmem:[%s4166_s1 + $0x38] sm:$0xff] }
   0xa   :  { %2428 = vmatprep.subr.msk.mxu0 %vm533_vm1, %v81_v10  ;;  %v93_v24 = vld [vmem:[%s4167_s2 + $0x58] sm:$0xff]  ;;  %v92_v25 = vld [vmem:[%s4167_s2 + $0x50] sm:$0xff]  ;;  %v37_v26 = vld [vmem:[%s4166_s1 + $0x40] sm:$0xff] }
   0xb   :  { %v38_v27 = vld [vmem:[%s4166_s1 + $0x48] sm:$0xff]  ;;  %v94_v29 = vld [vmem:[%s4167_s2 + $0x60] sm:$0xff]  ;;  %v39_v30 = vld [vmem:[%s4166_s1 + $0x50] sm:$0xff] }
   0xc   :  { %2429 = vmatpush3.msk.msra.mxu0 %vm533_vm1, %v81_v10  ;;  %v95_v28 = vld [vmem:[%s4167_s2 + $0x68] sm:$0xff]  ;;  %v40_v31 = vld [vmem:[%s4166_s1 + $0x58] sm:$0xff]  ;;  %v96_v33 = vld [vmem:[%s4167_s2 + $0x70] sm:$0xff] }
   0xd   :  { %2431 = vmatmul.mubr.msk.f32.vlgmr.msra.gmra.mrb[0].mxu0 %vm382_vm0, %v30_v11  ;;  %159 = vperm.xlu1 %2688, %v87_v12   ;;  %v97_v32 = vld [vmem:[%s4167_s2 + $0x78] sm:$0xff]  ;;  %v41_v34 = vld [vmem:[%s4166_s1 + $0x60] sm:$0xff]  ;;  %v42_v35 = vld [vmem:[%s4166_s1 + $0x68] sm:$0xff] }
   0xe   :  { %154 = vperm.xlu0 %2687, %v86_v13   ;;  %2433 = vmatprep.mubr.msk.f32.mxu0 %vm382_vm0, %v31_v14  ;;  %v99_v36 = vld [vmem:[%s4167_s2 + $0x88] sm:$0xff]  ;;  %v98_v37 = vld [vmem:[%s4167_s2 + $0x80] sm:$0xff]  ;;  %v43_v38 = vld [vmem:[%s4166_s1 + $0x70] sm:$0xff] }
   0xf   :  { %v44_v39 = vld [vmem:[%s4166_s1 + $0x78] sm:$0xff]  ;;  %v100_v41 = vld [vmem:[%s4167_s2 + $0x90] sm:$0xff]  ;;  %v45_v42 = vld [vmem:[%s4166_s1 + $0x80] sm:$0xff] }
  0x10   :  { %v101_v40 = vld [vmem:[%s4167_s2 + $0x98] sm:$0xff]  ;;  %v46_v43 = vld [vmem:[%s4166_s1 + $0x88] sm:$0xff]  ;;  %v102_v45 = vld [vmem:[%s4167_s2 + $0xa0] sm:$0xff] }
  0x11   :  { %2434 = vmatmul.mubr.msk.f32.gmra.mrb[2].mxu0 %vm382_vm0, %v32_v15  ;;  %169 = vperm.xlu1 %2688, %v89_v16   ;;  %v103_v44 = vld [vmem:[%s4167_s2 + $0xa8] sm:$0xff]  ;;  %v47_v46 = vld [vmem:[%s4166_s1 + $0x90] sm:$0xff]  ;;  %v48_v47 = vld [vmem:[%s4166_s1 + $0x98] sm:$0xff] }
  0x12   :  { %164 = vperm.xlu0 %2687, %v88_v17   ;;  %2436 = vmatprep.mubr.msk.f32.mxu0 %vm382_vm0, %v33_v18  ;;  %v105_v48 = vld [vmem:[%s4167_s2 + $0xb8] sm:$0xff]  ;;  %v104_v49 = vld [vmem:[%s4167_s2 + $0xb0] sm:$0xff]  ;;  %v49_v50 = vld [vmem:[%s4166_s1 + $0xa0] sm:$0xff] }
  0x13   :  { %v50_v51 = vld [vmem:[%s4166_s1 + $0xa8] sm:$0xff] }
  0x14   :  { %v107_v52 = vld [vmem:[%s4167_s2 + $0xc8] sm:$0xff] }
  0x15   :  { %2437 = vmatmul.mubr.msk.f32.gmra.mrb[4].mxu0 %vm382_vm0, %v34_v19  ;;  %179 = vperm.xlu1 %2688, %v91_v20  }
  0x16   :  { %174 = vperm.xlu0 %2687, %v90_v21   ;;  %2439 = vmatprep.mubr.msk.f32.mxu0 %vm382_vm0, %v35_v22 }
  0x19   :  { %2440 = vmatmul.mubr.msk.f32.gmra.mrb[6].mxu0 %vm382_vm0, %v36_v23  ;;  %189 = vperm.xlu1 %2688, %v93_v24  }
  0x1a   :  { %184 = vperm.xlu0 %2687, %v92_v25   ;;  %2442 = vmatprep.mubr.msk.f32.mxu0 %vm382_vm0, %v37_v26 }
  0x1d   :  { %2443 = vmatmul.mubr.msk.f32.gmra.mrb[8].mxu0 %vm382_vm0, %v38_v27  ;;  %199 = vperm.xlu1 %2688, %v95_v28  }
  0x1e   :  { %194 = vperm.xlu0 %2687, %v94_v29   ;;  %2445 = vmatprep.mubr.msk.f32.mxu0 %vm382_vm0, %v39_v30 }
  0x21   :  { %2446 = vmatmul.mubr.msk.f32.gmra.mrb[10].mxu0 %vm382_vm0, %v40_v31  ;;  %209 = vperm.xlu1 %2688, %v97_v32  }
  0x22   :  { %204 = vperm.xlu0 %2687, %v96_v33   ;;  %2448 = vmatprep.mubr.msk.f32.mxu0 %vm382_vm0, %v41_v34 }
  0x25   :  { %2449 = vmatmul.mubr.msk.f32.gmra.mrb[12].mxu0 %vm382_vm0, %v42_v35  ;;  %219 = vperm.xlu1 %2688, %v99_v36  }
  0x26   :  { %214 = vperm.xlu0 %2687, %v98_v37   ;;  %2451 = vmatprep.mubr.msk.f32.mxu0 %vm382_vm0, %v43_v38 }
  0x29   :  { %2452 = vmatmul.mubr.msk.f32.gmra.mrb[14].mxu0 %vm382_vm0, %v44_v39  ;;  %229 = vperm.xlu1 %2688, %v101_v40  }
  0x2a   :  { %224 = vperm.xlu0 %2687, %v100_v41   ;;  %2454 = vmatprep.mubr.msk.f32.mxu0 %vm382_vm0, %v45_v42 }
  0x2d   :  { %2455 = vmatmul.mubr.msk.f32.gmra.mrb[16].mxu0 %vm382_vm0, %v46_v43  ;;  %239 = vperm.xlu1 %2688, %v103_v44  }
  0x2e   :  { %234 = vperm.xlu0 %2687, %v102_v45   ;;  %2457 = vmatprep.mubr.msk.f32.mxu0 %vm382_vm0, %v47_v46 }
  0x31   :  { %2458 = vmatmul.mubr.msk.f32.gmra.mrb[18].mxu0 %vm382_vm0, %v48_v47  ;;  %249 = vperm.xlu1 %2688, %v105_v48  }
  0x32   :  { %244 = vperm.xlu0 %2687, %v104_v49   ;;  %2460 = vmatprep.mubr.msk.f32.mxu0 %vm382_vm0, %v49_v50 }
  0x33   :  { %14 = vsyncpa [#allocation4], 0  ;;  %v106_v53 = vld [vmem:[%s4167_s2 + $0xc0] sm:$0xff]  ;;  %v51_v54 = vld [vmem:[%s4166_s1 + $0xb0] sm:$0xff]  ;;  %v2714_v43 = vmov 0.0|0.0   ;;  %vm1282_vm2 = vcmask 130048  }
  0x34   :  { %v52_v55 = vld [vmem:[%s4166_s1 + $0xb8] sm:$0xff]  ;;  %v108_v57 = vld [vmem:[%s4167_s2 + $0xd0] sm:$0xff]  ;;  %v53_v58 = vld [vmem:[%s4166_s1 + $0xc0] sm:$0xff]  ;;  %2509 = vmatprep.subr.bf16.mxu1 %v2714_v43  ;;  %2557 = vmatprep.subr.bf16.mxu0 %v2714_v43  ;;  %vm2247_vm3 = vcmask 1043456  }
  0x35   :  { %2461 = vmatmul.mubr.msk.f32.gmra.mrb[20].mxu0 %vm382_vm0, %v50_v51  ;;  %259 = vperm.xlu1 %2688, %v107_v52   ;;  %v109_v56 = vld [vmem:[%s4167_s2 + $0xd8] sm:$0xff]  ;;  %v54_v59 = vld [vmem:[%s4166_s1 + $0xc8] sm:$0xff]  ;;  %v110_v61 = vld [vmem:[%s4167_s2 + $0xe0] sm:$0xff] }
  0x36   :  { %254 = vperm.xlu0 %2687, %v106_v53   ;;  %2463 = vmatprep.mubr.msk.f32.mxu0 %vm382_vm0, %v51_v54  ;;  %v111_v60 = vld [vmem:[%s4167_s2 + $0xe8] sm:$0xff]  ;;  %v55_v62 = vld [vmem:[%s4166_s1 + $0xd0] sm:$0xff]  ;;  %v56_v63 = vld [vmem:[%s4166_s1 + $0xd8] sm:$0xff] }
  0x37   :  { %v113_v0 = vld [vmem:[%s4167_s2 + $0xf8] sm:$0xff]  ;;  %v112_v1 = vld [vmem:[%s4167_s2 + $0xf0] sm:$0xff]  ;;  %v57_v2 = vld [vmem:[%s4166_s1 + $0xe0] sm:$0xff] }
  0x38   :  { %v58_v3 = vld [vmem:[%s4166_s1 + $0xe8] sm:$0xff]  ;;  %v114_v5 = vld [vmem:[%s4167_s2 + $0x100] sm:$0xff]  ;;  %v59_v6 = vld [vmem:[%s4166_s1 + $0xf0] sm:$0xff] }
  0x39   :  { %2464 = vmatmul.mubr.msk.f32.gmra.mrb[22].mxu0 %vm382_vm0, %v52_v55  ;;  %269 = vperm.xlu1 %2688, %v109_v56   ;;  %v115_v4 = vld [vmem:[%s4167_s2 + $0x108] sm:$0xff]  ;;  %v60_v7 = vld [vmem:[%s4166_s1 + $0xf8] sm:$0xff]  ;;  %v116_v9 = vld [vmem:[%s4167_s2 + $0x110] sm:$0xff] }
  0x3a   :  { %264 = vperm.xlu0 %2687, %v108_v57   ;;  %2466 = vmatprep.mubr.msk.f32.mxu0 %vm382_vm0, %v53_v58  ;;  %v117_v8 = vld [vmem:[%s4167_s2 + $0x118] sm:$0xff]  ;;  %v61_v10 = vld [vmem:[%s4166_s1 + $0x100] sm:$0xff]  ;;  %v62_v11 = vld [vmem:[%s4166_s1 + $0x108] sm:$0xff] }
  0x3b   :  { %v119_v12 = vld [vmem:[%s4167_s2 + $0x128] sm:$0xff]  ;;  %v118_v13 = vld [vmem:[%s4167_s2 + $0x120] sm:$0xff]  ;;  %v63_v14 = vld [vmem:[%s4166_s1 + $0x110] sm:$0xff] }
  0x3c   :  { %v64_v15 = vld [vmem:[%s4166_s1 + $0x118] sm:$0xff]  ;;  %v120_v17 = vld [vmem:[%s4167_s2 + $0x130] sm:$0xff]  ;;  %v65_v18 = vld [vmem:[%s4166_s1 + $0x120] sm:$0xff] }
  0x3d   :  { %2467 = vmatmul.mubr.msk.f32.gmra.mrb[24].mxu0 %vm382_vm0, %v54_v59  ;;  %279 = vperm.xlu1 %2688, %v111_v60   ;;  %v121_v16 = vld [vmem:[%s4167_s2 + $0x138] sm:$0xff]  ;;  %v66_v19 = vld [vmem:[%s4166_s1 + $0x128] sm:$0xff]  ;;  %v122_v21 = vld [vmem:[%s4167_s2 + $0x140] sm:$0xff] }
  0x3e   :  { %274 = vperm.xlu0 %2687, %v110_v61   ;;  %2469 = vmatprep.mubr.msk.f32.mxu0 %vm382_vm0, %v55_v62  ;;  %v123_v20 = vld [vmem:[%s4167_s2 + $0x148] sm:$0xff]  ;;  %v67_v22 = vld [vmem:[%s4166_s1 + $0x130] sm:$0xff]  ;;  %v68_v23 = vld [vmem:[%s4166_s1 + $0x138] sm:$0xff] }
  0x3f   :  { %v125_v24 = vld [vmem:[%s4167_s2 + $0x158] sm:$0xff]  ;;  %v124_v25 = vld [vmem:[%s4167_s2 + $0x150] sm:$0xff]  ;;  %v69_v26 = vld [vmem:[%s4166_s1 + $0x140] sm:$0xff] }
  0x40   :  { %v70_v27 = vld [vmem:[%s4166_s1 + $0x148] sm:$0xff]  ;;  %v126_v29 = vld [vmem:[%s4167_s2 + $0x160] sm:$0xff]  ;;  %v71_v30 = vld [vmem:[%s4166_s1 + $0x150] sm:$0xff] }
  0x41   :  { %2470 = vmatmul.mubr.msk.f32.gmra.mrb[26].mxu0 %vm382_vm0, %v56_v63  ;;  %289 = vperm.xlu1 %2688, %v113_v0   ;;  %v127_v28 = vld [vmem:[%s4167_s2 + $0x168] sm:$0xff]  ;;  %v72_v31 = vld [vmem:[%s4166_s1 + $0x158] sm:$0xff]  ;;  %v128_v33 = vld [vmem:[%s4167_s2 + $0x170] sm:$0xff] }
  0x42   :  { %284 = vperm.xlu0 %2687, %v112_v1   ;;  %2472 = vmatprep.mubr.msk.f32.mxu0 %vm382_vm0, %v57_v2  ;;  %v129_v32 = vld [vmem:[%s4167_s2 + $0x178] sm:$0xff]  ;;  %v73_v34 = vld [vmem:[%s4166_s1 + $0x160] sm:$0xff]  ;;  %v74_v35 = vld [vmem:[%s4166_s1 + $0x168] sm:$0xff] }
  0x43   :  { %v131_v36 = vld [vmem:[%s4167_s2 + $0x188] sm:$0xff]  ;;  %v130_v37 = vld [vmem:[%s4167_s2 + $0x180] sm:$0xff]  ;;  %v75_v38 = vld [vmem:[%s4166_s1 + $0x170] sm:$0xff] }
  0x44   :  { %v76_v39 = vld [vmem:[%s4166_s1 + $0x178] sm:$0xff]  ;;  %v1055_v40 = vld [vmem:[%s4169_s4 + $0x8] sm:$0xff]  ;;  %v1054_v41 = vld [vmem:[%s4169_s4] sm:$0xff] }
  0x45   :  { %2473 = vmatmul.mubr.msk.f32.gmra.mrb[28].mxu0 %vm382_vm0, %v58_v3  ;;  %299 = vperm.xlu1 %2688, %v115_v4   ;;  %v77_v42 = vld [vmem:[%s4166_s1 + $0x180] sm:$0xff]  ;;  %v78_v44 = vld [vmem:[%s4166_s1 + $0x188] sm:$0xff]  ;;  %v1057_v45 = vld [vmem:[%s4169_s4 + $0x18] sm:$0xff] }
  0x46   :  { %294 = vperm.xlu0 %2687, %v114_v5   ;;  %2475 = vmatprep.mubr.msk.f32.mxu0 %vm382_vm0, %v59_v6  ;;  %v1056_v46 = vld [vmem:[%s4169_s4 + $0x10] sm:$0xff]  ;;  %v1059_v47 = vld [vmem:[%s4169_s4 + $0x28] sm:$0xff]  ;;  %v1058_v48 = vld [vmem:[%s4169_s4 + $0x20] sm:$0xff] }
  0x47   :  { %v1061_v49 = vld [vmem:[%s4169_s4 + $0x38] sm:$0xff]  ;;  %v1060_v50 = vld [vmem:[%s4169_s4 + $0x30] sm:$0xff]  ;;  %v1063_v51 = vld [vmem:[%s4169_s4 + $0x48] sm:$0xff] }
  0x48   :  { %v1062_v52 = vld [vmem:[%s4169_s4 + $0x40] sm:$0xff]  ;;  %v1065_v53 = vld [vmem:[%s4169_s4 + $0x58] sm:$0xff]  ;;  %v1064_v54 = vld [vmem:[%s4169_s4 + $0x50] sm:$0xff] }
  0x49   :  { %2476 = vmatmul.mubr.msk.f32.gmra.mrb[30].mxu0 %vm382_vm0, %v60_v7  ;;  %309 = vperm.xlu1 %2688, %v117_v8   ;;  %v1067_v55 = vld [vmem:[%s4169_s4 + $0x68] sm:$0xff]  ;;  %v1066_v56 = vld [vmem:[%s4169_s4 + $0x60] sm:$0xff]  ;;  %v1069_v57 = vld [vmem:[%s4169_s4 + $0x78] sm:$0xff] }
  0x4a   :  { %304 = vperm.xlu0 %2687, %v116_v9   ;;  %2478 = vmatprep.mubr.msk.f32.mxu0 %vm382_vm0, %v61_v10  ;;  %v1068_v58 = vld [vmem:[%s4169_s4 + $0x70] sm:$0xff]  ;;  %v1071_v59 = vld [vmem:[%s4169_s4 + $0x88] sm:$0xff]  ;;  %v1070_v60 = vld [vmem:[%s4169_s4 + $0x80] sm:$0xff] }
  0x4b   :  { %v1073_v61 = vld [vmem:[%s4169_s4 + $0x98] sm:$0xff]  ;;  %v1072_v62 = vld [vmem:[%s4169_s4 + $0x90] sm:$0xff]  ;;  %v1075_v63 = vld [vmem:[%s4169_s4 + $0xa8] sm:$0xff] }
  0x4c   :  { %v1074_v0 = vld [vmem:[%s4169_s4 + $0xa0] sm:$0xff]  ;;  %v1077_v1 = vld [vmem:[%s4169_s4 + $0xb8] sm:$0xff]  ;;  %v1076_v2 = vld [vmem:[%s4169_s4 + $0xb0] sm:$0xff] }
  0x4d   :  { %2479 = vmatmul.mubr.msk.f32.gmra.mrb[32].mxu0 %vm382_vm0, %v62_v11  ;;  %319 = vperm.xlu1 %2688, %v119_v12   ;;  %v1079_v3 = vld [vmem:[%s4169_s4 + $0xc8] sm:$0xff]  ;;  %v1078_v4 = vld [vmem:[%s4169_s4 + $0xc0] sm:$0xff]  ;;  %v1081_v5 = vld [vmem:[%s4169_s4 + $0xd8] sm:$0xff] }
  0x4e   :  { %314 = vperm.xlu0 %2687, %v118_v13   ;;  %2481 = vmatprep.mubr.msk.f32.mxu0 %vm382_vm0, %v63_v14  ;;  %v1080_v6 = vld [vmem:[%s4169_s4 + $0xd0] sm:$0xff]  ;;  %v1083_v7 = vld [vmem:[%s4169_s4 + $0xe8] sm:$0xff]  ;;  %v1082_v8 = vld [vmem:[%s4169_s4 + $0xe0] sm:$0xff] }
  0x4f   :  { %v1085_v9 = vld [vmem:[%s4169_s4 + $0xf8] sm:$0xff]  ;;  %v1084_v10 = vld [vmem:[%s4169_s4 + $0xf0] sm:$0xff]  ;;  %v903_v11 = vld [vmem:[%s4168_s3 + $0x8] sm:$0xff] }
  0x50   :  { %v1087_v12 = vld [vmem:[%s4169_s4 + $0x108] sm:$0xff]  ;;  %1461 = vmatprep.mubr.f32.mxu1 %v903_v11  ;;  %v1086_v13 = vld [vmem:[%s4169_s4 + $0x100] sm:$0xff]  ;;  %v1089_v14 = vld [vmem:[%s4169_s4 + $0x118] sm:$0xff] }
  0x51   :  { %2482 = vmatmul.mubr.msk.f32.gmra.mrb[34].mxu0 %vm382_vm0, %v64_v15  ;;  %329 = vperm.xlu1 %2688, %v121_v16   ;;  %v1088_v15 = vld [vmem:[%s4169_s4 + $0x110] sm:$0xff] }
  0x52   :  { %324 = vperm.xlu0 %2687, %v120_v17   ;;  %2484 = vmatprep.mubr.msk.f32.mxu0 %vm382_vm0, %v65_v18  ;;  %v1091_v17 = vld [vmem:[%s4169_s4 + $0x128] sm:$0xf] }
  0x55   :  { %2485 = vmatmul.mubr.msk.f32.gmra.mrb[36].mxu0 %vm382_vm0, %v66_v19  ;;  %339 = vperm.xlu1 %2688, %v123_v20   ;;  %v1090_v19 = vld [vmem:[%s4169_s4 + $0x120] sm:$0xff]  ;;  %v1946_v20 = vld [vmem:[%s4170_s5 + $0x8] sm:$0xff] }
  0x56   :  { %334 = vperm.xlu0 %2687, %v122_v21   ;;  %2487 = vmatprep.mubr.msk.f32.mxu0 %vm382_vm0, %v67_v22  ;;  %v1945_v21 = vld [vmem:[%s4170_s5] sm:$0xff] }
  0x59   :  { %2488 = vmatmul.mubr.msk.f32.gmra.mrb[38].mxu0 %vm382_vm0, %v68_v23  ;;  %349 = vperm.xlu1 %2688, %v125_v24   ;;  %v1948_v24 = vld [vmem:[%s4170_s5 + $0x18] sm:$0xff] }
  0x5a   :  { %344 = vperm.xlu0 %2687, %v124_v25   ;;  %2490 = vmatprep.mubr.msk.f32.mxu0 %vm382_vm0, %v69_v26  ;;  %v1947_v25 = vld [vmem:[%s4170_s5 + $0x10] sm:$0xff] }
  0x5d   :  { %2491 = vmatmul.mubr.msk.f32.gmra.mrb[40].mxu0 %vm382_vm0, %v70_v27  ;;  %359 = vperm.xlu1 %2688, %v127_v28   ;;  %v1950_v27 = vld [vmem:[%s4170_s5 + $0x28] sm:$0xff] }
  0x5e   :  { %354 = vperm.xlu0 %2687, %v126_v29   ;;  %2493 = vmatprep.mubr.msk.f32.mxu0 %vm382_vm0, %v71_v30  ;;  %v1949_v29 = vld [vmem:[%s4170_s5 + $0x20] sm:$0xff]  ;;  %v1952_v30 = vld [vmem:[%s4170_s5 + $0x38] sm:$0xff] }
  0x61   :  { %2494 = vmatmul.mubr.msk.f32.gmra.mrb[42].mxu0 %vm382_vm0, %v72_v31  ;;  %369 = vperm.xlu1 %2688, %v129_v32   ;;  %v1951_v31 = vld [vmem:[%s4170_s5 + $0x30] sm:$0xff] }
  0x62   :  { %364 = vperm.xlu0 %2687, %v128_v33   ;;  %2496 = vmatprep.mubr.msk.f32.mxu0 %vm382_vm0, %v73_v34  ;;  %v1954_v34 = vld [vmem:[%s4170_s5 + $0x48] sm:$0xff] }
  0x65   :  { %2497 = vmatmul.mubr.msk.f32.gmra.mrb[44].mxu0 %vm382_vm0, %v74_v35  ;;  %379 = vperm.xlu1 %2688, %v131_v36   ;;  %v1953_v35 = vld [vmem:[%s4170_s5 + $0x40] sm:$0xff] }
  0x66   :  { %374 = vperm.xlu0 %2687, %v130_v37   ;;  %2499 = vmatprep.mubr.msk.f32.mxu0 %vm382_vm0, %v75_v38  ;;  %v1956_v37 = vld [vmem:[%s4170_s5 + $0x58] sm:$0xff] }
  0x69   :  { %2500 = vmatmul.mubr.msk.f32.gmra.mrb[46].mxu0 %vm382_vm0, %v76_v39  ;;  %1099 = vperm.xlu1 %2688, %v1055_v40   ;;  %v1955_v39 = vld [vmem:[%s4170_s5 + $0x50] sm:$0xff]  ;;  %v905_v40 = vld [vmem:[%s4168_s3 + $0x18] sm:$0xff] }
  0x6a   :  { %1094 = vperm.xlu0 %2687, %v1054_v41   ;;  %2502 = vmatprep.mubr.msk.f32.mxu0 %vm382_vm0, %v77_v42  ;;  %v1958_v41 = vld [vmem:[%s4170_s5 + $0x68] sm:$0xff]  ;;  %v1957_v42 = vld [vmem:[%s4170_s5 + $0x60] sm:$0xff] }
  0x6d   :  { %2503 = vmatmul.mubr.msk.f32.gmra.mrb[48].mxu0 %vm382_vm0, %v78_v44  ;;  %1109 = vperm.xlu1 %2688, %v1057_v45  }
  0x6e   :  { %1104 = vperm.xlu0 %2687, %v1056_v46   ;;  %2333 = vmatprep.mubr.msk.f32.mxu0 %vm1282_vm2, %v905_v40  ;;  %v1960_v46 = vld [vmem:[%s4170_s5 + $0x78] sm:$0xff] }
  0x71   :  { %1119 = vperm.xlu1 %2688, %v1059_v47   ;;  %v1959_v47 = vld [vmem:[%s4170_s5 + $0x70] sm:$0xff] }
  0x72   :  { %1114 = vperm.xlu0 %2687, %v1058_v48  }
  0x75   :  { %1129 = vperm.xlu1 %2688, %v1061_v49   ;;  %v1962_v49 = vld [vmem:[%s4170_s5 + $0x88] sm:$0xff] }
  0x76   :  { %1124 = vperm.xlu0 %2687, %v1060_v50  }
  0x79   :  { %1139 = vperm.xlu1 %2688, %v1063_v51   ;;  %v1961_v51 = vld [vmem:[%s4170_s5 + $0x80] sm:$0xff] }
  0x7a   :  { %1134 = vperm.xlu0 %2687, %v1062_v52   ;;  %v1964_v52 = vld [vmem:[%s4170_s5 + $0x98] sm:$0xff] }
  0x7d   :  { %1149 = vperm.xlu1 %2688, %v1065_v53   ;;  %v1963_v53 = vld [vmem:[%s4170_s5 + $0x90] sm:$0xff] }
  0x7e   :  { %1144 = vperm.xlu0 %2687, %v1064_v54  }
  0x81   :  { %1159 = vperm.xlu1 %2688, %v1067_v55  }
  0x82   :  { %1154 = vperm.xlu0 %2687, %v1066_v56   ;;  %v1966_v56 = vld [vmem:[%s4170_s5 + $0xa8] sm:$0xff] }
  0x84   :  { %v3231_v16 = vpop.permute.xlu0 %134  ;;  %v3236_v18 = vpop.permute.xlu1 %144 }
  0x85   :  { %1169 = vperm.xlu1 %2688, %v1069_v57   ;;  %v1965_v57 = vld [vmem:[%s4170_s5 + $0xa0] sm:$0xff] }
  0x86   :  { %1164 = vperm.xlu0 %2687, %v1068_v58  }
  0x88   :  { %v3247_v22 = vpop.permute.xlu0 %139  ;;  %v3249_v23 = vpop.permute.xlu1 %149 }
  0x89   :  { %1179 = vperm.xlu1 %2688, %v1071_v59   ;;  %v1968_v59 = vld [vmem:[%s4170_s5 + $0xb8] sm:$0xff] }
  0x8a   :  { %1174 = vperm.xlu0 %2687, %v1070_v60  }
  0x8c   :  { %v3262_v28 = vpop.permute.xlu1 %159 }
  0x8d   :  { %1189 = vperm.xlu1 %2688, %v1073_v61   ;;  %v3257_v26 = vpop.permute.xlu0 %154  ;;  %v1967_v61 = vld [vmem:[%s4170_s5 + $0xb0] sm:$0xff] }
  0x8e   :  { %1184 = vperm.xlu0 %2687, %v1072_v62  }
  0x90   :  { %v3275_v33 = vpop.permute.xlu1 %169 }
  0x91   :  { %1199 = vperm.xlu1 %2688, %v1075_v63   ;;  %v3273_v32 = vpop.permute.xlu0 %164 }
  0x92   :  { %1194 = vperm.xlu0 %2687, %v1074_v0  }
  0x94   :  { %v3288_v38 = vpop.permute.xlu1 %179 }
  0x95   :  { %1209 = vperm.xlu1 %2688, %v1077_v1   ;;  %v3283_v36 = vpop.permute.xlu0 %174 }
  0x96   :  { %1204 = vperm.xlu0 %2687, %v1076_v2   ;;  %v1970_v2 = vld [vmem:[%s4170_s5 + $0xc8] sm:$0xff] }
  0x98   :  { %v3305_v45 = vpop.permute.xlu1 %189 }
  0x99   :  { %1219 = vperm.xlu1 %2688, %v1079_v3   ;;  %v3303_v44 = vpop.permute.xlu0 %184 }
  0x9a   :  { %1214 = vperm.xlu0 %2687, %v1078_v4   ;;  %v1969_v4 = vld [vmem:[%s4170_s5 + $0xc0] sm:$0xff] }
  0x9c   :  { %v3318_v50 = vpop.permute.xlu1 %199 }
  0x9d   :  { %1229 = vperm.xlu1 %2688, %v1081_v5   ;;  %v3313_v48 = vpop.permute.xlu0 %194 }
  0x9e   :  { %1224 = vperm.xlu0 %2687, %v1080_v6  }
  0xa0   :  { %v3331_v55 = vpop.permute.xlu1 %209 }
  0xa1   :  { %1239 = vperm.xlu1 %2688, %v1083_v7   ;;  %v3329_v54 = vpop.permute.xlu0 %204 }
  0xa2   :  { %1234 = vperm.xlu0 %2687, %v1082_v8  }
  0xa4   :  { %v3344_v60 = vpop.permute.xlu1 %219 }
  0xa5   :  { %1249 = vperm.xlu1 %2688, %v1085_v9   ;;  %v3339_v58 = vpop.permute.xlu0 %214 }
  0xa6   :  { %1244 = vperm.xlu0 %2687, %v1084_v10  }
  0xa8   :  { %v3359_v8 = vpop.permute.xlu1 %229 }
  0xa9   :  { %1259 = vperm.xlu1 %2688, %v1087_v12   ;;  %v3357_v5 = vpop.permute.xlu0 %224 }
  0xaa   :  { %1254 = vperm.xlu0 %2687, %v1086_v13   ;;  %v1972_v13 = vld [vmem:[%s4170_s5 + $0xd8] sm:$0xff] }
  0xad   :  { %1269 = vperm.xlu1 %2688, %v1089_v14  }
  0xae   :  { %1264 = vperm.xlu0 %2687, %v1088_v15   ;;  %v1971_v15 = vld [vmem:[%s4170_s5 + $0xd0] sm:$0xff] }
  0xb1   :  { %1279 = vperm.xlu1 %2688, %v1091_v17  }
  0xb2   :  { %1274 = vperm.xlu0 %2687, %v1090_v19  }
  0xb5   :  { %1990 = vperm.xlu1 %2688, %v1946_v20  }
  0xb6   :  { %1985 = vperm.xlu0 %2687, %v1945_v21  }
  0xb9   :  { %2000 = vperm.xlu1 %2688, %v1948_v24   ;;  %v3377_v24 = vpop.permute.xlu1 %239 }
  0xba   :  { %1995 = vperm.xlu0 %2687, %v1947_v25  }
  0xbd   :  { %2010 = vperm.xlu1 %2688, %v1950_v27   ;;  %v1973_v27 = vld [vmem:[%s4170_s5 + $0xe0] sm:$0xff] }
  0xbe   :  { %2005 = vperm.xlu0 %2687, %v1949_v29  }
  0xc1   :  { %2020 = vperm.xlu1 %2688, %v1952_v30  }
  0xc2   :  { %2015 = vperm.xlu0 %2687, %v1951_v31  }
  0xc5   :  { %2030 = vperm.xlu1 %2688, %v1954_v34  }
  0xc6   :  { %2025 = vperm.xlu0 %2687, %v1953_v35   ;;  %v1976_v35 = vld [vmem:[%s4170_s5 + $0xf8] sm:$0xff] }
  0xc9   :  { %2040 = vperm.xlu1 %2688, %v1956_v37  }
  0xca   :  { %2035 = vperm.xlu0 %2687, %v1955_v39   ;;  %v1975_v39 = vld [vmem:[%s4170_s5 + $0xf0] sm:$0xff] }
  0xcd   :  { %2050 = vperm.xlu1 %2688, %v1958_v41  }
  0xce   :  { %2045 = vperm.xlu0 %2687, %v1957_v42   ;;  %v3393_v42 = vpop.permute.xlu1 %249 }
  0xd1   :  { %2060 = vperm.xlu1 %2688, %v1960_v46  }
  0xd2   :  { %2055 = vperm.xlu0 %2687, %v1959_v47  }
  0xd5   :  { %2070 = vperm.xlu1 %2688, %v1962_v49  }
  0xd6   :  { %2065 = vperm.xlu0 %2687, %v1961_v51   ;;  %v1978_v51 = vld [vmem:[%s4170_s5 + $0x108] sm:$0xff] }
  0xd9   :  { %2080 = vperm.xlu1 %2688, %v1964_v52  }
  0xda   :  { %2075 = vperm.xlu0 %2687, %v1963_v53   ;;  %v1977_v53 = vld [vmem:[%s4170_s5 + $0x100] sm:$0xff] }
  0xdd   :  { %2090 = vperm.xlu1 %2688, %v1966_v56  }
  0xde   :  { %2085 = vperm.xlu0 %2687, %v1965_v57  }
  0xe0   :  { %v2432_v62 = vpop.f32.mrb[0].mxu0 }
  0xe1   :  { %v609_v63 = vadd.f32 %v2432_v62, %v3247_v22  ;;  %v603_v0 = vpop.f32.mrb[1].mxu0  ;;  %2100 = vperm.xlu1 %2688, %v1968_v59  }
  0xe2   :  { %v604_v1 = vadd.f32 %v603_v0, %v3231_v16  ;;  %2095 = vperm.xlu0 %2687, %v1967_v61   ;;  %v3412_v0 = vpop.permute.xlu1 %259 }
  0xe3   :  { %v853_v3 = vmax.f32 %v609_v63, 0.0  ;;  %v1980_v63 = vld [vmem:[%s4170_s5 + $0x118] sm:$0xff] }
  0xe4   :  { %v852_v6 = vmax.f32 %v604_v1, 0.0  ;;  %v2435_v7 = vpop.f32.mrb[2].mxu0 }
  0xe5   :  { %v619_v9 = vadd.f32 %v2435_v7, %v3249_v23  ;;  %v613_v10 = vpop.f32.mrb[3].mxu0  ;;  %2110 = vperm.xlu1 %2688, %v1970_v2   ;;  %v1974_v23 = vld [vmem:[%s4170_s5 + $0xe8] sm:$0xff] }
  0xe6   :  { %v614_v11 = vadd.f32 %v613_v10, %v3236_v18  ;;  %2105 = vperm.xlu0 %2687, %v1969_v4   ;;  %v2510_v12 = vpack.c.bf16 %v853_v3, %v852_v6  ;;  %v3371_v18 = vpop.permute.xlu0 %234 }
  0xe7   :  { %v855_v14 = vmax.f32 %v619_v9, 0.0  ;;  %v1982_v9 = vld [vmem:[%s4170_s5 + $0x128] sm:$0xf] }
  0xe8   :  { %v854_v16 = vmax.f32 %v614_v11, 0.0  ;;  %v2438_v17 = vpop.f32.mrb[4].mxu0  ;;  %2511 = vmatpush1.bf16.msra.mxu1 %v2510_v12  ;;  %v1981_v11 = vld [vmem:[%s4170_s5 + $0x120] sm:$0xff] }
  0xe9   :  { %v629_v19 = vadd.f32 %v2438_v17, %v3262_v28  ;;  %v623_v20 = vpop.f32.mrb[5].mxu0  ;;  %2120 = vperm.xlu1 %2688, %v1972_v13   ;;  %2512 = vmatprep.subr.bf16.mxu1 %v2714_v43 }
  0xea   :  { %v2513_v21 = vpack.c.bf16 %v855_v14, %v854_v16  ;;  %v624_v22 = vadd.f32 %v623_v20, %v3257_v26  ;;  %2115 = vperm.xlu0 %2687, %v1971_v15   ;;  %v3391_v40 = vpop.permute.xlu0 %244  ;;  %v3428_v14 = vpop.permute.xlu1 %269  ;;  %v2256_v20 = vld [vmem:[#allocation2] sm:$0x1] }
  0xeb   :  { %v857_v25 = vmax.f32 %v629_v19, 0.0 }
  0xec   :  { %v856_v28 = vmax.f32 %v624_v22, 0.0  ;;  %v2441_v29 = vpop.f32.mrb[6].mxu0  ;;  %2514 = vmatpush1.bf16.msra.mxu1 %v2513_v21 }
  0xed   :  { %v639_v30 = vadd.f32 %v2441_v29, %v3275_v33  ;;  %v633_v31 = vpop.f32.mrb[7].mxu0  ;;  %2130 = vperm.xlu1 %2688, %v1974_v23   ;;  %2515 = vmatprep.subr.bf16.mxu1 %v2714_v43 }
  0xee   :  { %v2516_v26 = vpack.c.bf16 %v857_v25, %v856_v28  ;;  %v634_v34 = vadd.f32 %v633_v31, %v3273_v32  ;;  %2125 = vperm.xlu0 %2687, %v1973_v27  }
  0xef   :  { %v859_v37 = vmax.f32 %v639_v30, 0.0  ;;  %v280_v30 = vpop.permute.xlu1 %279 }
  0xf0   :  { %v858_v33 = vmax.f32 %v634_v34, 0.0  ;;  %v2444_v41 = vpop.f32.mrb[8].mxu0  ;;  %2517 = vmatpush1.bf16.msra.mxu1 %v2516_v26 }
  0xf1   :  { %v649_v46 = vadd.f32 %v2444_v41, %v3288_v38  ;;  %v643_v32 = vpop.f32.mrb[9].mxu0  ;;  %2140 = vperm.xlu1 %2688, %v1976_v35   ;;  %2518 = vmatprep.subr.bf16.mxu1 %v2714_v43 }
  0xf2   :  { %v2519_v47 = vpack.c.bf16 %v859_v37, %v858_v33  ;;  %v644_v49 = vadd.f32 %v643_v32, %v3283_v36  ;;  %2135 = vperm.xlu0 %2687, %v1975_v39   ;;  %v3406_v36 = vpop.permute.xlu0 %254 }
  0xf3   :  { %v861_v52 = vmax.f32 %v649_v46, 0.0  ;;  %v290_v46 = vpop.permute.xlu1 %289 }
  0xf4   :  { %v860_v56 = vmax.f32 %v644_v49, 0.0  ;;  %v2447_v57 = vpop.f32.mrb[10].mxu0  ;;  %2520 = vmatpush1.bf16.msra.mxu1 %v2519_v47 }
  0xf5   :  { %v659_v38 = vadd.f32 %v2447_v57, %v3305_v45  ;;  %v653_v59 = vpop.f32.mrb[11].mxu0  ;;  %2150 = vperm.xlu1 %2688, %v1978_v51   ;;  %2521 = vmatprep.subr.bf16.mxu1 %v2714_v43  ;;  %v1979_v45 = vld [vmem:[%s4170_s5 + $0x110] sm:$0xff] }
  0xf6   :  { %v2522_v61 = vpack.c.bf16 %v861_v52, %v860_v56  ;;  %v654_v62 = vadd.f32 %v653_v59, %v3303_v44  ;;  %2145 = vperm.xlu0 %2687, %v1977_v53   ;;  %v3426_v12 = vpop.permute.xlu0 %264 }
  0xf7   :  { %v863_v1 = vmax.f32 %v659_v38, 0.0  ;;  %v300_v38 = vpop.permute.xlu1 %299 }
  0xf8   :  { %v862_v2 = vmax.f32 %v654_v62, 0.0  ;;  %v2450_v3 = vpop.f32.mrb[12].mxu0  ;;  %2523 = vmatpush1.bf16.msra.mxu1 %v2522_v61 }
  0xf9   :  { %v669_v4 = vadd.f32 %v2450_v3, %v3318_v50  ;;  %v663_v6 = vpop.f32.mrb[13].mxu0  ;;  %2160 = vperm.xlu1 %2688, %v1980_v63   ;;  %2524 = vmatprep.subr.bf16.mxu1 %v2714_v43 }
  0xfa   :  { %v2525_v44 = vpack.c.bf16 %v863_v1, %v862_v2  ;;  %v664_v7 = vadd.f32 %v663_v6, %v3313_v48  ;;  %2155 = vperm.xlu0 %2687, %v1979_v45   ;;  %v3435_v27 = vpop.permute.xlu0 %274 }
  0xfb   :  { %v865_v10 = vmax.f32 %v669_v4, 0.0  ;;  %v310_v6 = vpop.permute.xlu1 %309 }
  0xfc   :  { %v864_v50 = vmax.f32 %v664_v7, 0.0  ;;  %v2453_v13 = vpop.f32.mrb[14].mxu0  ;;  %2526 = vmatpush1.bf16.msra.mxu1 %v2525_v44 }
  0xfd   :  { %v679_v15 = vadd.f32 %v2453_v13, %v3331_v55  ;;  %v673_v48 = vpop.f32.mrb[15].mxu0  ;;  %2170 = vperm.xlu1 %2688, %v1982_v9   ;;  %2527 = vmatprep.subr.bf16.mxu1 %v2714_v43 }
  0xfe   :  { %v2528_v16 = vpack.c.bf16 %v865_v10, %v864_v50  ;;  %v674_v17 = vadd.f32 %v673_v48, %v3329_v54  ;;  %2165 = vperm.xlu0 %2687, %v1981_v11  }
  0xff   :  { %v867_v19 = vmax.f32 %v679_v15, 0.0  ;;  %v320_v48 = vpop.permute.xlu1 %319 }
 0x100   :  { %v866_v21 = vmax.f32 %v674_v17, 0.0  ;;  %v2456_v22 = vpop.f32.mrb[16].mxu0  ;;  %2529 = vmatpush1.bf16.msra.mxu1 %v2528_v16 }
 0x101   :  { %v689_v23 = vadd.f32 %v2456_v22, %v3344_v60  ;;  %v683_v25 = vpop.f32.mrb[17].mxu0  ;;  %2530 = vmatprep.subr.bf16.mxu1 %v2714_v43 }
 0x102   :  { %v2531_v55 = vpack.c.bf16 %v867_v19, %v866_v21  ;;  %v684_v28 = vadd.f32 %v683_v25, %v3339_v58  ;;  %2259 = vperm.xlu0 %2687, %v2256_v20  }
 0x103   :  { %v869_v29 = vmax.f32 %v689_v23, 0.0 }
 0x104   :  { %v868_v54 = vmax.f32 %v684_v28, 0.0  ;;  %v2459_v31 = vpop.f32.mrb[18].mxu0  ;;  %2532 = vmatpush1.bf16.msra.mxu1 %v2531_v55 }
 0x105   :  { %v699_v26 = vadd.f32 %v2459_v31, %v3359_v8  ;;  %v693_v34 = vpop.f32.mrb[19].mxu0  ;;  %2533 = vmatprep.subr.bf16.mxu1 %v2714_v43  ;;  %v285_v8 = vpop.permute.xlu0 %284 }
 0x106   :  { %v2534_v60 = vpack.c.bf16 %v869_v29, %v868_v54  ;;  %v694_v35 = vadd.f32 %v693_v34, %v3357_v5 }
 0x107   :  { %v871_v37 = vmax.f32 %v699_v26, 0.0 }
 0x108   :  { %v870_v39 = vmax.f32 %v694_v35, 0.0  ;;  %v2462_v33 = vpop.f32.mrb[20].mxu0  ;;  %2535 = vmatpush1.bf16.msra.mxu1 %v2534_v60  ;;  %v902_v35 = vld [vmem:[%s4168_s3] sm:$0xff] }
 0x109   :  { %v709_v58 = vadd.f32 %v2462_v33, %v3377_v24  ;;  %v703_v41 = vpop.f32.mrb[21].mxu0  ;;  %2536 = vmatprep.subr.bf16.mxu1 %v2714_v43  ;;  %v295_v62 = vpop.permute.xlu0 %294 }
 0x10a   :  { %v2537_v32 = vpack.c.bf16 %v871_v37, %v870_v39  ;;  %v704_v47 = vadd.f32 %v703_v41, %v3371_v18  ;;  %v907_v41 = vld [vmem:[%s4168_s3 + $0x28] sm:$0xff] }
 0x10b   :  { %v873_v49 = vmax.f32 %v709_v58, 0.0 }
 0x10c   :  { %v872_v51 = vmax.f32 %v704_v47, 0.0  ;;  %v2465_v52 = vpop.f32.mrb[22].mxu0  ;;  %2538 = vmatpush1.bf16.msra.mxu1 %v2537_v32 }
 0x10d   :  { %v719_v5 = vadd.f32 %v2465_v52, %v3393_v42  ;;  %v713_v53 = vpop.f32.mrb[23].mxu0  ;;  %2539 = vmatprep.subr.bf16.mxu1 %v2714_v43 }
 0x10e   :  { %v2540_v56 = vpack.c.bf16 %v873_v49, %v872_v51  ;;  %v714_v24 = vadd.f32 %v713_v53, %v3391_v40  ;;  %v906_v49 = vld [vmem:[%s4168_s3 + $0x20] sm:$0xff] }
 0x10f   :  { %v875_v57 = vmax.f32 %v719_v5, 0.0 }
 0x110   :  { %v874_v59 = vmax.f32 %v714_v24, 0.0  ;;  %v2468_v61 = vpop.f32.mrb[24].mxu0  ;;  %2541 = vmatpush1.bf16.msra.mxu1 %v2540_v56  ;;  %v911_v24 = vld [vmem:[%s4168_s3 + $0x48] sm:$0xff] }
 0x111   :  { %v729_v18 = vadd.f32 %v2468_v61, %v3412_v0  ;;  %v723_v63 = vpop.f32.mrb[25].mxu0  ;;  %2542 = vmatprep.subr.bf16.mxu1 %v2714_v43  ;;  %v305_v0 = vpop.permute.xlu0 %304  ;;  %v910_v61 = vld [vmem:[%s4168_s3 + $0x40] sm:$0xff] }
 0x112   :  { %v2543_v1 = vpack.c.bf16 %v875_v57, %v874_v59  ;;  %v724_v42 = vadd.f32 %v723_v63, %v3406_v36 }
 0x113   :  { %v877_v45 = vmax.f32 %v729_v18, 0.0 }
 0x114   :  { %v876_v2 = vmax.f32 %v724_v42, 0.0  ;;  %v2471_v3 = vpop.f32.mrb[26].mxu0  ;;  %2544 = vmatpush1.bf16.msra.mxu1 %v2543_v1 }
 0x115   :  { %v739_v40 = vadd.f32 %v2471_v3, %v3428_v14  ;;  %v733_v4 = vpop.f32.mrb[27].mxu0  ;;  %2545 = vmatprep.subr.bf16.mxu1 %v2714_v43  ;;  %v315_v19 = vpop.permute.xlu0 %314 }
 0x116   :  { %v2546_v44 = vpack.c.bf16 %v877_v45, %v876_v2  ;;  %v734_v7 = vadd.f32 %v733_v4, %v3426_v12  ;;  %v915_v45 = vld [vmem:[%s4168_s3 + $0x68] sm:$0xff] }
 0x117   :  { %v879_v9 = vmax.f32 %v739_v40, 0.0 }
 0x118   :  { %v878_v10 = vmax.f32 %v734_v7, 0.0  ;;  %v2474_v11 = vpop.f32.mrb[28].mxu0  ;;  %2547 = vmatpush1.bf16.msra.mxu1 %v2546_v44 }
 0x119   :  { %v749_v50 = vadd.f32 %v2474_v11, %v280_v30  ;;  %v743_v36 = vpop.f32.mrb[29].mxu0  ;;  %2548 = vmatprep.subr.bf16.mxu1 %v2714_v43  ;;  %v325_v31 = vpop.permute.xlu0 %324 }
 0x11a   :  { %v2549_v13 = vpack.c.bf16 %v879_v9, %v878_v10  ;;  %v744_v15 = vadd.f32 %v743_v36, %v3435_v27  ;;  %v330_v27 = vpop.permute.xlu1 %329  ;;  %v919_v10 = vld [vmem:[%s4168_s3 + $0x88] sm:$0xff] }
 0x11b   :  { %v881_v14 = vmax.f32 %v749_v50, 0.0 }
 0x11c   :  { %v880_v16 = vmax.f32 %v744_v15, 0.0  ;;  %v2477_v17 = vpop.f32.mrb[30].mxu0  ;;  %2550 = vmatpush1.bf16.msra.mxu1 %v2549_v13  ;;  %v918_v15 = vld [vmem:[%s4168_s3 + $0x80] sm:$0xff] }
 0x11d   :  { %v759_v20 = vadd.f32 %v2477_v17, %v290_v46  ;;  %v753_v12 = vpop.f32.mrb[31].mxu0  ;;  %2551 = vmatprep.subr.bf16.mxu1 %v2714_v43  ;;  %v335_v51 = vpop.permute.xlu0 %334 }
 0x11e   :  { %v2552_v21 = vpack.c.bf16 %v881_v14, %v880_v16  ;;  %v754_v22 = vadd.f32 %v753_v12, %v285_v8  ;;  %v340_v32 = vpop.permute.xlu1 %339 }
 0x11f   :  { %v883_v23 = vmax.f32 %v759_v20, 0.0  ;;  %v923_v20 = vld [vmem:[%s4168_s3 + $0xa8] sm:$0xff] }
 0x120   :  { %v882_v25 = vmax.f32 %v754_v22, 0.0  ;;  %v2480_v55 = vpop.f32.mrb[32].mxu0  ;;  %2553 = vmatpush1.bf16.msra.mxu1 %v2552_v21 }
 0x121   :  { %v769_v28 = vadd.f32 %v2480_v55, %v300_v38  ;;  %v763_v29 = vpop.f32.mrb[33].mxu0  ;;  %2554 = vmatprep.subr.bf16.mxu1 %v2714_v43  ;;  %v345_v2 = vpop.permute.xlu0 %344 }
 0x122   :  { %v2555_v30 = vpack.c.bf16 %v883_v23, %v882_v25  ;;  %v764_v54 = vadd.f32 %v763_v29, %v295_v62  ;;  %v350_v63 = vpop.permute.xlu1 %349  ;;  %v922_v23 = vld [vmem:[%s4168_s3 + $0xa0] sm:$0xff] }
 0x123   :  { %v885_v26 = vmax.f32 %v769_v28, 0.0 }
 0x124   :  { %v884_v34 = vmax.f32 %v764_v54, 0.0  ;;  %v2483_v60 = vpop.f32.mrb[34].mxu0  ;;  %2556 = vmatpush1.bf16.msra.mxu1 %v2555_v30  ;;  %v927_v30 = vld [vmem:[%s4168_s3 + $0xc8] sm:$0xff] }
 0x125   :  { %v779_v37 = vadd.f32 %v2483_v60, %v310_v6  ;;  %v773_v39 = vpop.f32.mrb[35].mxu0  ;;  %2584 = vmatprep.subr.bf16.mxu1 %v2714_v43  ;;  %v914_v6 = vld [vmem:[%s4168_s3 + $0x60] sm:$0xff]  ;;  %v355_v14 = vpop.permute.xlu0 %354 }
 0x126   :  { %v2558_v33 = vpack.c.bf16 %v885_v26, %v884_v34  ;;  %v774_v58 = vadd.f32 %v773_v39, %v305_v0  ;;  %v360_v50 = vpop.permute.xlu1 %359  ;;  %v926_v60 = vld [vmem:[%s4168_s3 + $0xc0] sm:$0xff] }
 0x127   :  { %v887_v46 = vmax.f32 %v779_v37, 0.0  ;;  %1462 = vmatmul.mubr.f32.vlgmr.msra.gmra.mrb[0].mxu1 %v902_v35 }
 0x128   :  { %v886_v47 = vmax.f32 %v774_v58, 0.0  ;;  %v2486_v8 = vpop.f32.mrb[36].mxu0  ;;  %2559 = vmatpush1.bf16.msra.mxu0 %v2558_v33  ;;  %2593 = vmatpush1.bf16.msra.mxu1 %v2558_v33  ;;  %v931_v58 = vld [vmem:[%s4168_s3 + $0xe8] sm:$0xff] }
 0x129   :  { %v789_v52 = vadd.f32 %v2486_v8, %v320_v48  ;;  %v783_v5 = vpop.f32.mrb[37].mxu0  ;;  %1466 = vmatprep.mubr.f32.mxu1 %v907_v41  ;;  %2560 = vmatprep.subr.bf16.mxu0 %v2714_v43  ;;  %v365_v54 = vpop.permute.xlu0 %364  ;;  %v930_v8 = vld [vmem:[%s4168_s3 + $0xe0] sm:$0xff] }
 0x12a   :  { %v2561_v53 = vpack.c.bf16 %v887_v46, %v886_v47  ;;  %v784_v56 = vadd.f32 %v783_v5, %v315_v19  ;;  %2585 = vmatprep.subr.bf16.mxu1 %v2714_v43  ;;  %v370_v28 = vpop.permute.xlu1 %369 }
 0x12b   :  { %v889_v57 = vmax.f32 %v789_v52, 0.0  ;;  %1467 = vmatmul.mubr.f32.gmra.mrb[2].mxu1 %v906_v49 }
 0x12c   :  { %v888_v38 = vmax.f32 %v784_v56, 0.0  ;;  %v2489_v59 = vpop.f32.mrb[38].mxu0  ;;  %2562 = vmatpush1.bf16.msra.mxu0 %v2561_v53  ;;  %2594 = vmatpush1.bf16.msra.mxu1 %v2561_v53  ;;  %v935_v56 = vld [vmem:[%s4168_s3 + $0x108] sm:$0xff] }
 0x12d   :  { %v799_v62 = vadd.f32 %v2489_v59, %v330_v27  ;;  %v793_v18 = vpop.f32.mrb[39].mxu0  ;;  %1471 = vmatprep.mubr.f32.mxu1 %v911_v24  ;;  %2563 = vmatprep.subr.bf16.mxu0 %v2714_v43  ;;  %v375_v49 = vpop.permute.xlu0 %374 }
 0x12e   :  { %v2564_v1 = vpack.c.bf16 %v889_v57, %v888_v38  ;;  %v794_v42 = vadd.f32 %v793_v18, %v325_v31  ;;  %2586 = vmatprep.subr.bf16.mxu1 %v2714_v43  ;;  %v380_v46 = vpop.permute.xlu1 %379  ;;  %v934_v38 = vld [vmem:[%s4168_s3 + $0x100] sm:$0xff]  ;;  %v904_v18 = vld [vmem:[%s4168_s3 + $0x10] sm:$0xff] }
 0x12f   :  { %v891_v3 = vmax.f32 %v799_v62, 0.0  ;;  %1472 = vmatmul.mubr.f32.gmra.mrb[4].mxu1 %v910_v61  ;;  %v939_v61 = vld [vmem:[%s4168_s3 + $0x128] sm:$0xff]  ;;  %v938_v62 = vld [vmem:[%s4168_s3 + $0x120] sm:$0xff] }
 0x130   :  { %v890_v40 = vmax.f32 %v794_v42, 0.0  ;;  %v2492_v4 = vpop.f32.mrb[40].mxu0  ;;  %2565 = vmatpush1.bf16.msra.mxu0 %v2564_v1  ;;  %2595 = vmatpush1.bf16.msra.mxu1 %v2564_v1  ;;  %v942_v1 = vld [vmem:[%s4168_s3 + $0x140] sm:$0xff]  ;;  %v908_v42 = vld [vmem:[%s4168_s3 + $0x30] sm:$0xff] }
 0x131   :  { %v809_v44 = vadd.f32 %v2492_v4, %v340_v32  ;;  %v803_v7 = vpop.f32.mrb[41].mxu0  ;;  %1476 = vmatprep.mubr.f32.mxu1 %v915_v45  ;;  %2566 = vmatprep.subr.bf16.mxu0 %v2714_v43  ;;  %v947_v45 = vld [vmem:[%s4168_s3 + $0x168] sm:$0xff] }
 0x132   :  { %v2567_v0 = vpack.c.bf16 %v891_v3, %v890_v40  ;;  %v804_v9 = vadd.f32 %v803_v7, %v335_v51  ;;  %2587 = vmatprep.subr.bf16.mxu1 %v2714_v43  ;;  %v946_v3 = vld [vmem:[%s4168_s3 + $0x160] sm:$0xff]  ;;  %v912_v40 = vld [vmem:[%s4168_s3 + $0x50] sm:$0xff]  ;;  %v951_v4 = vld [vmem:[%s4168_s3 + $0x188] sm:$0xff] }
 0x133   :  { %v893_v11 = vmax.f32 %v809_v44, 0.0  ;;  %1477 = vmatmul.mubr.f32.gmra.mrb[6].mxu1 %v914_v6  ;;  %v917_v6 = vld [vmem:[%s4168_s3 + $0x78] sm:$0xff]  ;;  %v950_v44 = vld [vmem:[%s4168_s3 + $0x180] sm:$0xff]  ;;  %v916_v7 = vld [vmem:[%s4168_s3 + $0x70] sm:$0xff] }
 0x134   :  { %v892_v36 = vmax.f32 %v804_v9, 0.0  ;;  %v2495_v13 = vpop.f32.mrb[42].mxu0  ;;  %2568 = vmatpush1.bf16.msra.mxu0 %v2567_v0  ;;  %2596 = vmatpush1.bf16.msra.mxu1 %v2567_v0  ;;  %v955_v0 = vld [vmem:[%s4168_s3 + $0x1a8] sm:$0xff]  ;;  %v921_v9 = vld [vmem:[%s4168_s3 + $0x98] sm:$0xff] }
 0x135   :  { %v819_v48 = vadd.f32 %v2495_v13, %v350_v63  ;;  %v813_v16 = vpop.f32.mrb[43].mxu0  ;;  %1481 = vmatprep.mubr.f32.mxu1 %v919_v10  ;;  %2569 = vmatprep.subr.bf16.mxu0 %v2714_v43  ;;  %v909_v63 = vld [vmem:[%s4168_s3 + $0x38] sm:$0xff]  ;;  %v954_v10 = vld [vmem:[%s4168_s3 + $0x1a0] sm:$0xff] }
 0x136   :  { %v2570_v17 = vpack.c.bf16 %v893_v11, %v892_v36  ;;  %v814_v19 = vadd.f32 %v813_v16, %v345_v2  ;;  %2588 = vmatprep.subr.bf16.mxu1 %v2714_v43  ;;  %v913_v2 = vld [vmem:[%s4168_s3 + $0x58] sm:$0xff]  ;;  %v920_v11 = vld [vmem:[%s4168_s3 + $0x90] sm:$0xff]  ;;  %v958_v13 = vld [vmem:[%s4168_s3 + $0x1c0] sm:$0xff] }
 0x137   :  { %v895_v12 = vmax.f32 %v819_v48, 0.0  ;;  %1482 = vmatmul.mubr.f32.gmra.mrb[8].mxu1 %v918_v15  ;;  %v925_v36 = vld [vmem:[%s4168_s3 + $0xb8] sm:$0xff]  ;;  %v924_v15 = vld [vmem:[%s4168_s3 + $0xb0] sm:$0xff]  ;;  %v962_v16 = vld [vmem:[%s4168_s3 + $0x1e0] sm:$0xff] }
 0x138   :  { %v894_v21 = vmax.f32 %v814_v19, 0.0  ;;  %v2498_v22 = vpop.f32.mrb[44].mxu0  ;;  %2571 = vmatpush1.bf16.msra.mxu0 %v2570_v17  ;;  %2597 = vmatpush1.bf16.msra.mxu1 %v2570_v17  ;;  %v929_v48 = vld [vmem:[%s4168_s3 + $0xd8] sm:$0xff]  ;;  %v928_v17 = vld [vmem:[%s4168_s3 + $0xd0] sm:$0xff]  ;;  %v967_v19 = vld [vmem:[%s4168_s3 + $0x208] sm:$0xff] }
 0x139   :  { %v829_v25 = vadd.f32 %v2498_v22, %v360_v50  ;;  %v823_v55 = vpop.f32.mrb[45].mxu0  ;;  %1486 = vmatprep.mubr.f32.mxu1 %v923_v20  ;;  %2572 = vmatprep.subr.bf16.mxu0 %v2714_v43  ;;  %v959_v50 = vld [vmem:[%s4168_s3 + $0x1c8] sm:$0xff]  ;;  %v933_v20 = vld [vmem:[%s4168_s3 + $0xf8] sm:$0xff] }
 0x13a   :  { %v2573_v29 = vpack.c.bf16 %v895_v12, %v894_v21  ;;  %v824_v27 = vadd.f32 %v823_v55, %v355_v14  ;;  %2589 = vmatprep.subr.bf16.mxu1 %v2714_v43  ;;  %v963_v14 = vld [vmem:[%s4168_s3 + $0x1e8] sm:$0xff]  ;;  %v966_v12 = vld [vmem:[%s4168_s3 + $0x200] sm:$0xff]  ;;  %v932_v21 = vld [vmem:[%s4168_s3 + $0xf0] sm:$0xff] }
 0x13b   :  { %v897_v31 = vmax.f32 %v829_v25, 0.0  ;;  %1487 = vmatmul.mubr.f32.gmra.mrb[10].mxu1 %v922_v23  ;;  %v971_v22 = vld [vmem:[%s4168_s3 + $0x228] sm:$0xff]  ;;  %v937_v23 = vld [vmem:[%s4168_s3 + $0x118] sm:$0xff]  ;;  %v970_v25 = vld [vmem:[%s4168_s3 + $0x220] sm:$0xff] }
 0x13c   :  { %v896_v26 = vmax.f32 %v824_v27, 0.0  ;;  %v2501_v34 = vpop.f32.mrb[46].mxu0  ;;  %2574 = vmatpush1.bf16.msra.mxu0 %v2573_v29  ;;  %2598 = vmatpush1.bf16.msra.mxu1 %v2573_v29  ;;  %v936_v55 = vld [vmem:[%s4168_s3 + $0x110] sm:$0xff]  ;;  %v941_v29 = vld [vmem:[%s4168_s3 + $0x138] sm:$0xff]  ;;  %v974_v27 = vld [vmem:[%s4168_s3 + $0x240] sm:$0xff] }
 0x13d   :  { %v839_v35 = vadd.f32 %v2501_v34, %v370_v28  ;;  %v833_v37 = vpop.f32.mrb[47].mxu0  ;;  %1491 = vmatprep.mubr.f32.mxu1 %v927_v30  ;;  %2575 = vmatprep.subr.bf16.mxu0 %v2714_v43  ;;  %v975_v28 = vld [vmem:[%s4168_s3 + $0x248] sm:$0xff]  ;;  %v940_v30 = vld [vmem:[%s4168_s3 + $0x130] sm:$0xff] }
 0x13e   :  { %v2576_v39 = vpack.c.bf16 %v897_v31, %v896_v26  ;;  %v834_v33 = vadd.f32 %v833_v37, %v365_v54  ;;  %2590 = vmatprep.subr.bf16.mxu1 %v2714_v43  ;;  %v979_v54 = vld [vmem:[%s4168_s3 + $0x268] sm:$0xff]  ;;  %v945_v31 = vld [vmem:[%s4168_s3 + $0x158] sm:$0xff]  ;;  %v978_v26 = vld [vmem:[%s4168_s3 + $0x260] sm:$0xff] }
 0x13f   :  { %v899_v41 = vmax.f32 %v839_v35, 0.0  ;;  %1492 = vmatmul.mubr.f32.gmra.mrb[12].mxu1 %v926_v60  ;;  %v944_v34 = vld [vmem:[%s4168_s3 + $0x150] sm:$0xff]  ;;  %v983_v60 = vld [vmem:[%s4168_s3 + $0x288] sm:$0xff]  ;;  %v949_v35 = vld [vmem:[%s4168_s3 + $0x178] sm:$0xff] }
 0x140   :  { %v898_v32 = vmax.f32 %v834_v33, 0.0  ;;  %v2504_v47 = vpop.f32.mrb[48].mxu0  ;;  %2577 = vmatpush1.bf16.msra.mxu0 %v2576_v39  ;;  %2599 = vmatpush1.bf16.msra.mxu1 %v2576_v39  ;;  %v982_v37 = vld [vmem:[%s4168_s3 + $0x280] sm:$0xff]  ;;  %v948_v39 = vld [vmem:[%s4168_s3 + $0x170] sm:$0xff]  ;;  %v987_v33 = vld [vmem:[%s4168_s3 + $0x2a8] sm:$0xff] }
 0x141   :  { %v849_v51 = vadd.f32 %v2504_v47, %v380_v46  ;;  %v843_v52 = vpop.f32.mrb[49].mxu0  ;;  %1496 = vmatprep.mubr.f32.mxu1 %v931_v58  ;;  %2578 = vmatprep.subr.bf16.mxu0 %v2714_v43  ;;  %v953_v58 = vld [vmem:[%s4168_s3 + $0x198] sm:$0xff]  ;;  %v952_v46 = vld [vmem:[%s4168_s3 + $0x190] sm:$0xff] }
 0x142   :  { %v2579_v5 = vpack.c.bf16 %v899_v41, %v898_v32  ;;  %v844_v53 = vadd.f32 %v843_v52, %v375_v49  ;;  %2591 = vmatprep.subr.bf16.mxu1 %v2714_v43  ;;  %v986_v41 = vld [vmem:[%s4168_s3 + $0x2a0] sm:$0xff]  ;;  %v991_v32 = vld [vmem:[%s4168_s3 + $0x2c8] sm:$0xff]  ;;  %v957_v47 = vld [vmem:[%s4168_s3 + $0x1b8] sm:$0xff] }
 0x143   :  { %v901_v24 = vmax.f32 %v849_v51, 0.0  ;;  %1497 = vmatmul.mubr.f32.gmra.mrb[14].mxu1 %v930_v8  ;;  %v990_v8 = vld [vmem:[%s4168_s3 + $0x2c0] sm:$0xff]  ;;  %v956_v49 = vld [vmem:[%s4168_s3 + $0x1b0] sm:$0xff]  ;;  %v995_v51 = vld [vmem:[%s4168_s3 + $0x2e8] sm:$0xff] }
 0x144   :  { %v900_v57 = vmax.f32 %v844_v53, 0.0  ;;  %2580 = vmatpush1.bf16.msra.mxu0 %v2579_v5  ;;  %2600 = vmatpush1.bf16.msra.mxu1 %v2579_v5  ;;  %v961_v52 = vld [vmem:[%s4168_s3 + $0x1d8] sm:$0xff]  ;;  %v994_v5 = vld [vmem:[%s4168_s3 + $0x2e0] sm:$0xff]  ;;  %v960_v53 = vld [vmem:[%s4168_s3 + $0x1d0] sm:$0xff] }
 0x145   :  { %1501 = vmatprep.mubr.f32.mxu1 %v935_v56  ;;  %2581 = vmatprep.subr.bf16.mxu0 %v2714_v43  ;;  %v999_v56 = vld [vmem:[%s4168_s3 + $0x308] sm:$0xff] }
 0x146   :  { %v2582_v59 = vpack.c.bf16 %v901_v24, %v900_v57  ;;  %2592 = vmatprep.subr.bf16.mxu1 %v2714_v43  ;;  %v943_v43 = vld [vmem:[%s4168_s3 + $0x148] sm:$0xff]  ;;  %v965_v24 = vld [vmem:[%s4168_s3 + $0x1f8] sm:$0xff]  ;;  %v998_v57 = vld [vmem:[%s4168_s3 + $0x300] sm:$0xff] }
 0x147   :  { %1502 = vmatmul.mubr.f32.gmra.mrb[16].mxu1 %v934_v38  ;;  %v964_v38 = vld [vmem:[%s4168_s3 + $0x1f0] sm:$0xff] }
 0x148   :  { %2583 = vmatpush1.bf16.msra.mxu0 %v2582_v59  ;;  %2601 = vmatpush1.bf16.msra.mxu1 %v2582_v59  ;;  %v1003_v59 = vld [vmem:[%s4168_s3 + $0x328] sm:$0xff] }
 0x149   :  { %1506 = vmatprep.mubr.f32.mxu1 %v939_v61  ;;  %v969_v61 = vld [vmem:[%s4168_s3 + $0x218] sm:$0xff] }
 0x14b   :  { %1507 = vmatmul.mubr.f32.gmra.mrb[18].mxu1 %v938_v62  ;;  %1717 = vmatmul.mubr.f32.vlgmr.msra.gmra.mrb[50].mxu0 %v904_v18  ;;  %v1002_v62 = vld [vmem:[%s4168_s3 + $0x320] sm:$0xff]  ;;  %v968_v18 = vld [vmem:[%s4168_s3 + $0x210] sm:$0xff] }
 0x14c   :  { %1511 = vmatprep.mubr.f32.mxu1 %v943_v43  ;;  %2334 = vmatprep.mubr.msk.f32.mxu0 %vm1282_vm2, %v909_v63  ;;  %v1007_v43 = vld [vmem:[%s4168_s3 + $0x348] sm:$0xff]  ;;  %v973_v63 = vld [vmem:[%s4168_s3 + $0x238] sm:$0xff] }
 0x14f   :  { %1512 = vmatmul.mubr.f32.gmra.mrb[20].mxu1 %v942_v1  ;;  %1722 = vmatmul.mubr.f32.gmra.mrb[52].mxu0 %v908_v42  ;;  %v1006_v1 = vld [vmem:[%s4168_s3 + $0x340] sm:$0xff]  ;;  %v972_v42 = vld [vmem:[%s4168_s3 + $0x230] sm:$0xff] }
 0x150   :  { %1516 = vmatprep.mubr.f32.mxu1 %v947_v45  ;;  %2335 = vmatprep.mubr.msk.f32.mxu0 %vm1282_vm2, %v913_v2  ;;  %v1011_v45 = vld [vmem:[%s4168_s3 + $0x368] sm:$0xff]  ;;  %v977_v2 = vld [vmem:[%s4168_s3 + $0x258] sm:$0xff] }
 0x153   :  { %1517 = vmatmul.mubr.f32.gmra.mrb[22].mxu1 %v946_v3  ;;  %1727 = vmatmul.mubr.f32.gmra.mrb[54].mxu0 %v912_v40  ;;  %v1010_v3 = vld [vmem:[%s4168_s3 + $0x360] sm:$0xff]  ;;  %v976_v40 = vld [vmem:[%s4168_s3 + $0x250] sm:$0xff] }
 0x154   :  { %1521 = vmatprep.mubr.f32.mxu1 %v951_v4  ;;  %2336 = vmatprep.mubr.msk.f32.mxu0 %vm1282_vm2, %v917_v6  ;;  %v1015_v4 = vld [vmem:[%s4168_s3 + $0x388] sm:$0xff]  ;;  %v981_v6 = vld [vmem:[%s4168_s3 + $0x278] sm:$0xff] }
 0x157   :  { %1522 = vmatmul.mubr.f32.gmra.mrb[24].mxu1 %v950_v44  ;;  %1732 = vmatmul.mubr.f32.gmra.mrb[56].mxu0 %v916_v7  ;;  %v1014_v44 = vld [vmem:[%s4168_s3 + $0x380] sm:$0xff]  ;;  %v980_v7 = vld [vmem:[%s4168_s3 + $0x270] sm:$0xff] }
 0x158   :  { %1526 = vmatprep.mubr.f32.mxu1 %v955_v0  ;;  %2337 = vmatprep.mubr.msk.f32.mxu0 %vm1282_vm2, %v921_v9  ;;  %v1019_v0 = vld [vmem:[%s4168_s3 + $0x3a8] sm:$0xff]  ;;  %v985_v9 = vld [vmem:[%s4168_s3 + $0x298] sm:$0xff] }
 0x15b   :  { %1527 = vmatmul.mubr.f32.gmra.mrb[26].mxu1 %v954_v10  ;;  %1737 = vmatmul.mubr.f32.gmra.mrb[58].mxu0 %v920_v11  ;;  %v1018_v10 = vld [vmem:[%s4168_s3 + $0x3a0] sm:$0xff]  ;;  %v984_v11 = vld [vmem:[%s4168_s3 + $0x290] sm:$0xff] }
 0x15c   :  { %1531 = vmatprep.mubr.f32.mxu1 %v959_v50  ;;  %2338 = vmatprep.mubr.msk.f32.mxu0 %vm1282_vm2, %v925_v36  ;;  %v1023_v50 = vld [vmem:[%s4168_s3 + $0x3c8] sm:$0xff]  ;;  %v989_v36 = vld [vmem:[%s4168_s3 + $0x2b8] sm:$0xff] }
 0x15f   :  { %1532 = vmatmul.mubr.f32.gmra.mrb[28].mxu1 %v958_v13  ;;  %1742 = vmatmul.mubr.f32.gmra.mrb[60].mxu0 %v924_v15  ;;  %v1022_v13 = vld [vmem:[%s4168_s3 + $0x3c0] sm:$0xff]  ;;  %v988_v15 = vld [vmem:[%s4168_s3 + $0x2b0] sm:$0xff] }
 0x160   :  { %1536 = vmatprep.mubr.f32.mxu1 %v963_v14  ;;  %2339 = vmatprep.mubr.msk.f32.mxu0 %vm1282_vm2, %v929_v48  ;;  %v1027_v14 = vld [vmem:[%s4168_s3 + $0x3e8] sm:$0xff]  ;;  %v993_v48 = vld [vmem:[%s4168_s3 + $0x2d8] sm:$0xff] }
 0x163   :  { %1537 = vmatmul.mubr.f32.gmra.mrb[30].mxu1 %v962_v16  ;;  %1747 = vmatmul.mubr.f32.gmra.mrb[62].mxu0 %v928_v17  ;;  %v1026_v16 = vld [vmem:[%s4168_s3 + $0x3e0] sm:$0xff]  ;;  %v992_v17 = vld [vmem:[%s4168_s3 + $0x2d0] sm:$0xff] }
 0x164   :  { %1541 = vmatprep.mubr.f32.mxu1 %v967_v19  ;;  %2340 = vmatprep.mubr.msk.f32.mxu0 %vm1282_vm2, %v933_v20  ;;  %v1031_v19 = vld [vmem:[%s4168_s3 + $0x408] sm:$0xff]  ;;  %v997_v20 = vld [vmem:[%s4168_s3 + $0x2f8] sm:$0xff] }
 0x167   :  { %1542 = vmatmul.mubr.f32.gmra.mrb[32].mxu1 %v966_v12  ;;  %1752 = vmatmul.mubr.f32.gmra.mrb[64].mxu0 %v932_v21  ;;  %v1030_v12 = vld [vmem:[%s4168_s3 + $0x400] sm:$0xff]  ;;  %v996_v21 = vld [vmem:[%s4168_s3 + $0x2f0] sm:$0xff] }
 0x168   :  { %1546 = vmatprep.mubr.f32.mxu1 %v971_v22  ;;  %2341 = vmatprep.mubr.msk.f32.mxu0 %vm1282_vm2, %v937_v23  ;;  %v1035_v22 = vld [vmem:[%s4168_s3 + $0x428] sm:$0xff]  ;;  %v1001_v23 = vld [vmem:[%s4168_s3 + $0x318] sm:$0xff] }
 0x16b   :  { %1547 = vmatmul.mubr.f32.gmra.mrb[34].mxu1 %v970_v25  ;;  %1757 = vmatmul.mubr.f32.gmra.mrb[66].mxu0 %v936_v55  ;;  %v1034_v25 = vld [vmem:[%s4168_s3 + $0x420] sm:$0xff]  ;;  %v1000_v55 = vld [vmem:[%s4168_s3 + $0x310] sm:$0xff] }
 0x16c   :  { %1551 = vmatprep.mubr.f32.mxu1 %v975_v28  ;;  %2342 = vmatprep.mubr.msk.f32.mxu0 %vm1282_vm2, %v941_v29  ;;  %v1039_v28 = vld [vmem:[%s4168_s3 + $0x448] sm:$0xff]  ;;  %v1005_v29 = vld [vmem:[%s4168_s3 + $0x338] sm:$0xff] }
 0x16f   :  { %1552 = vmatmul.mubr.f32.gmra.mrb[36].mxu1 %v974_v27  ;;  %1762 = vmatmul.mubr.f32.gmra.mrb[68].mxu0 %v940_v30  ;;  %v1038_v27 = vld [vmem:[%s4168_s3 + $0x440] sm:$0xff]  ;;  %v1004_v30 = vld [vmem:[%s4168_s3 + $0x330] sm:$0xff] }
 0x170   :  { %1556 = vmatprep.mubr.f32.mxu1 %v979_v54  ;;  %2343 = vmatprep.mubr.msk.f32.mxu0 %vm1282_vm2, %v945_v31  ;;  %v1043_v54 = vld [vmem:[%s4168_s3 + $0x468] sm:$0xff]  ;;  %v1009_v31 = vld [vmem:[%s4168_s3 + $0x358] sm:$0xff] }
 0x173   :  { %1557 = vmatmul.mubr.f32.gmra.mrb[38].mxu1 %v978_v26  ;;  %1767 = vmatmul.mubr.f32.gmra.mrb[70].mxu0 %v944_v34  ;;  %v3865_v26 = vpop.permute.xlu0 %1094  ;;  %v1042_v34 = vld [vmem:[%s4168_s3 + $0x460] sm:$0xff] }
 0x174   :  { %1561 = vmatprep.mubr.f32.mxu1 %v983_v60  ;;  %2344 = vmatprep.mubr.msk.f32.mxu0 %vm1282_vm2, %v949_v35  ;;  %v1008_v60 = vld [vmem:[%s4168_s3 + $0x350] sm:$0xff]  ;;  %v3874_v35 = vpop.permute.xlu1 %1099 }
 0x177   :  { %1562 = vmatmul.mubr.f32.gmra.mrb[40].mxu1 %v982_v37  ;;  %1772 = vmatmul.mubr.f32.gmra.mrb[72].mxu0 %v948_v39  ;;  %v1047_v37 = vld [vmem:[%s4168_s3 + $0x488] sm:$0xff]  ;;  %v1013_v39 = vld [vmem:[%s4168_s3 + $0x378] sm:$0xff] }
 0x178   :  { %1566 = vmatprep.mubr.f32.mxu1 %v987_v33  ;;  %2345 = vmatprep.mubr.msk.f32.mxu0 %vm1282_vm2, %v953_v58  ;;  %v1046_v33 = vld [vmem:[%s4168_s3 + $0x480] sm:$0xff]  ;;  %v1012_v58 = vld [vmem:[%s4168_s3 + $0x370] sm:$0xff] }
 0x17b   :  { %1567 = vmatmul.mubr.f32.gmra.mrb[42].mxu1 %v986_v41  ;;  %1777 = vmatmul.mubr.f32.gmra.mrb[74].mxu0 %v952_v46  ;;  %v3889_v41 = vpop.permute.xlu0 %1104  ;;  %v1051_v46 = vld [vmem:[%s4168_s3 + $0x4a8] sm:$0xf] }
 0x17c   :  { %1571 = vmatprep.mubr.f32.mxu1 %v991_v32  ;;  %2346 = vmatprep.mubr.msk.f32.mxu0 %vm1282_vm2, %v957_v47  ;;  %v1017_v32 = vld [vmem:[%s4168_s3 + $0x398] sm:$0xff]  ;;  %v3897_v47 = vpop.permute.xlu1 %1109 }
 0x17f   :  { %1572 = vmatmul.mubr.f32.gmra.mrb[44].mxu1 %v990_v8  ;;  %1782 = vmatmul.mubr.f32.gmra.mrb[76].mxu0 %v956_v49  ;;  %v1050_v8 = vld [vmem:[%s4168_s3 + $0x4a0] sm:$0xf]  ;;  %v1016_v49 = vld [vmem:[%s4168_s3 + $0x390] sm:$0xff] }
 0x180   :  { %1576 = vmatprep.mubr.f32.mxu1 %v995_v51  ;;  %2347 = vmatprep.mubr.msk.f32.mxu0 %vm1282_vm2, %v961_v52  ;;  %v1021_v51 = vld [vmem:[%s4168_s3 + $0x3b8] sm:$0xff] }
 0x181   :  { %v1033_v52 = vld [vmem:[%s4168_s3 + $0x418] sm:$0xff] }
 0x183   :  { %1577 = vmatmul.mubr.f32.gmra.mrb[46].mxu1 %v994_v5  ;;  %1787 = vmatmul.mubr.f32.gmra.mrb[78].mxu0 %v960_v53  ;;  %v3912_v5 = vpop.permute.xlu0 %1114  ;;  %v1020_v53 = vld [vmem:[%s4168_s3 + $0x3b0] sm:$0xff] }
 0x184   :  { %1581 = vmatprep.mubr.f32.mxu1 %v999_v56  ;;  %2348 = vmatprep.mubr.msk.f32.mxu0 %vm1282_vm2, %v965_v24  ;;  %v1032_v56 = vld [vmem:[%s4168_s3 + $0x410] sm:$0xff]  ;;  %v3922_v24 = vpop.permute.xlu1 %1119 }
 0x187   :  { %1582 = vmatmul.mubr.f32.gmra.mrb[48].mxu1 %v998_v57  ;;  %1792 = vmatmul.mubr.f32.gmra.mrb[80].mxu0 %v964_v38  ;;  %v1025_v57 = vld [vmem:[%s4168_s3 + $0x3d8] sm:$0xff] }
 0x188   :  { %1586 = vmatprep.mubr.f32.mxu1 %v1003_v59  ;;  %2349 = vmatprep.mubr.msk.f32.mxu0 %vm1282_vm2, %v969_v61  ;;  %v1037_v38 = vld [vmem:[%s4168_s3 + $0x438] sm:$0xff]  ;;  %v1024_v59 = vld [vmem:[%s4168_s3 + $0x3d0] sm:$0xff] }
 0x189   :  { %v1036_v61 = vld [vmem:[%s4168_s3 + $0x430] sm:$0xff] }
 0x18b   :  { %1587 = vmatmul.mubr.f32.gmra.mrb[50].mxu1 %v1002_v62  ;;  %1797 = vmatmul.mubr.f32.gmra.mrb[82].mxu0 %v968_v18  ;;  %v3938_v62 = vpop.permute.xlu0 %1124  ;;  %v1029_v18 = vld [vmem:[%s4168_s3 + $0x3f8] sm:$0xff] }
 0x18c   :  { %1591 = vmatprep.mubr.f32.mxu1 %v1007_v43  ;;  %2350 = vmatprep.mubr.msk.f32.mxu0 %vm1282_vm2, %v973_v63  ;;  %v1041_v43 = vld [vmem:[%s4168_s3 + $0x458] sm:$0xff]  ;;  %v3946_v63 = vpop.permute.xlu1 %1129 }
 0x18f   :  { %1592 = vmatmul.mubr.f32.gmra.mrb[52].mxu1 %v1006_v1  ;;  %1802 = vmatmul.mubr.f32.gmra.mrb[84].mxu0 %v972_v42  ;;  %v1028_v1 = vld [vmem:[%s4168_s3 + $0x3f0] sm:$0xff] }
 0x190   :  { %1596 = vmatprep.mubr.f32.mxu1 %v1011_v45  ;;  %2351 = vmatprep.mubr.msk.f32.mxu0 %vm1282_vm2, %v977_v2  ;;  %v1040_v42 = vld [vmem:[%s4168_s3 + $0x450] sm:$0xff]  ;;  %v1045_v45 = vld [vmem:[%s4168_s3 + $0x478] sm:$0xff]  ;;  %v3959_v2 = vpop.permute.xlu0 %1134 }
 0x193   :  { %1597 = vmatmul.mubr.f32.gmra.mrb[54].mxu1 %v1010_v3  ;;  %1807 = vmatmul.mubr.f32.gmra.mrb[86].mxu0 %v976_v40  ;;  %v1044_v3 = vld [vmem:[%s4168_s3 + $0x470] sm:$0xff]  ;;  %v3965_v40 = vpop.permute.xlu1 %1139 }
 0x194   :  { %1601 = vmatprep.mubr.f32.mxu1 %v1015_v4  ;;  %2352 = vmatprep.mubr.msk.f32.mxu0 %vm1282_vm2, %v981_v6  ;;  %v1049_v4 = vld [vmem:[%s4168_s3 + $0x498] sm:$0xff]  ;;  %v1048_v6 = vld [vmem:[%s4168_s3 + $0x490] sm:$0xff] }
 0x197   :  { %1602 = vmatmul.mubr.f32.gmra.mrb[56].mxu1 %v1014_v44  ;;  %1812 = vmatmul.mubr.f32.gmra.mrb[88].mxu0 %v980_v7  ;;  %v3974_v44 = vpop.permute.xlu0 %1144  ;;  %v1053_v7 = vld [vmem:[%s4168_s3 + $0x4b8] sm:$0xf] }
 0x198   :  { %1606 = vmatprep.mubr.f32.mxu1 %v1019_v0  ;;  %2353 = vmatprep.mubr.msk.f32.mxu0 %vm1282_vm2, %v985_v9  ;;  %v3979_v0 = vpop.permute.xlu1 %1149  ;;  %v1052_v9 = vld [vmem:[%s4168_s3 + $0x4b0] sm:$0xf]  ;;  %s2715_s3 = smov [#allocation3]  }
 0x199   :  { %s2274_s8 = sshll.u32 %s2715_s3, 4  ;;  %s2275_s8 = int_to_ptr.vmem [resolvable:$true] %s2274_s8 }
 0x19a   :  { %s2689_s9 = scalar_lea.vmem %s2275_s8, 16  ;;  %s2693_s10 = scalar_lea.vmem %s2275_s8, 32 }
 0x19b   :  { %1607 = vmatmul.mubr.f32.gmra.mrb[58].mxu1 %v1018_v10  ;;  %1817 = vmatmul.mubr.f32.gmra.mrb[90].mxu0 %v984_v11  ;;  %v3985_v10 = vpop.permute.xlu0 %1154  ;;  %p2690_p0 = scmp.ne.s32.totalorder %s2275_s8, %s2689_s9  ;;  %p2694_p1 = scmp.lt.s32.totalorder %s2275_s8, %s2275_s8 }
 0x19c   :  { %1611 = vmatprep.mubr.f32.mxu1 %v1023_v50  ;;  %2354 = vmatprep.mubr.msk.f32.mxu0 %vm1282_vm2, %v989_v36  ;;  %v3987_v11 = vpop.permute.xlu1 %1159  ;;  %p2695_p2 = scmp.lt.s32.totalorder %s2693_s10, %s2689_s9 }
 0x19e   :  { %p2696_p3 = por %p2695_p2, %p2694_p1 }
 0x19f   :  { %1612 = vmatmul.mubr.f32.gmra.mrb[60].mxu1 %v1022_v13  ;;  %1822 = vmatmul.mubr.f32.gmra.mrb[92].mxu0 %v988_v15  ;;  %v3989_v50 = vpop.permute.xlu0 %1164 }
 0x1a0   :  { %1616 = vmatprep.mubr.f32.mxu1 %v1027_v14  ;;  %2355 = vmatprep.mubr.msk.f32.mxu0 %vm1282_vm2, %v993_v48  ;;  %v3991_v36 = vpop.permute.xlu1 %1169  ;;  %p2697_p4 = pnand %p2696_p3, %p2690_p0 }
 0x1a3   :  { %1617 = vmatmul.mubr.f32.gmra.mrb[62].mxu1 %v1026_v16  ;;  %1827 = vmatmul.mubr.f32.gmra.mrb[94].mxu0 %v992_v17  ;;  %v3993_v13 = vpop.permute.xlu0 %1174 }
 0x1a4   :  { %1621 = vmatprep.mubr.f32.mxu1 %v1031_v19  ;;  %2356 = vmatprep.mubr.msk.f32.mxu0 %vm1282_vm2, %v997_v20  ;;  %v3995_v15 = vpop.permute.xlu1 %1179 }
 0x1a7   :  { %1622 = vmatmul.mubr.f32.gmra.mrb[64].mxu1 %v1030_v12  ;;  %1832 = vmatmul.mubr.f32.gmra.mrb[96].mxu0 %v996_v21  ;;  %v3997_v14 = vpop.permute.xlu0 %1184 }
 0x1a8   :  { %1626 = vmatprep.mubr.f32.mxu1 %v1035_v22  ;;  %2357 = vmatprep.mubr.msk.f32.mxu0 %vm1282_vm2, %v1001_v23  ;;  %v3999_v48 = vpop.permute.xlu1 %1189 }
 0x1ab   :  { %1627 = vmatmul.mubr.f32.gmra.mrb[66].mxu1 %v1034_v25  ;;  %1837 = vmatmul.mubr.f32.gmra.mrb[98].mxu0 %v1000_v55  ;;  %v4001_v16 = vpop.permute.xlu0 %1194 }
 0x1ac   :  { %1631 = vmatprep.mubr.f32.mxu1 %v1039_v28  ;;  %2358 = vmatprep.mubr.msk.f32.mxu0 %vm1282_vm2, %v1005_v29  ;;  %v4003_v17 = vpop.permute.xlu1 %1199 }
 0x1af   :  { %1632 = vmatmul.mubr.f32.gmra.mrb[68].mxu1 %v1038_v27  ;;  %1842 = vmatmul.mubr.f32.gmra.mrb[100].mxu0 %v1004_v30  ;;  %v4005_v19 = vpop.permute.xlu0 %1204 }
 0x1b0   :  { %1636 = vmatprep.mubr.f32.mxu1 %v1043_v54  ;;  %2359 = vmatprep.mubr.msk.f32.mxu0 %vm1282_vm2, %v1009_v31  ;;  %v4007_v20 = vpop.permute.xlu1 %1209 }
 0x1b3   :  { %1637 = vmatmul.mubr.f32.gmra.mrb[70].mxu1 %v1042_v34  ;;  %1847 = vmatmul.mubr.f32.gmra.mrb[102].mxu0 %v1008_v60  ;;  %v4009_v12 = vpop.permute.xlu0 %1214 }
 0x1b4   :  { %1641 = vmatprep.mubr.f32.mxu1 %v1047_v37  ;;  %2360 = vmatprep.mubr.msk.f32.mxu0 %vm1282_vm2, %v1013_v39  ;;  %v4011_v21 = vpop.permute.xlu1 %1219 }
 0x1b7   :  { %1642 = vmatmul.mubr.f32.gmra.mrb[72].mxu1 %v1046_v33  ;;  %1852 = vmatmul.mubr.f32.gmra.mrb[104].mxu0 %v1012_v58  ;;  %v4013_v25 = vpop.permute.xlu0 %1224 }
 0x1b8   :  { %1646 = vmatprep.mubr.f32.mxu1 %v1051_v46  ;;  %2361 = vmatprep.mubr.msk.f32.mxu0 %vm1282_vm2, %v1017_v32  ;;  %v4015_v28 = vpop.permute.xlu1 %1229 }
 0x1bb   :  { %1647 = vmatmul.mubr.f32.gmra.mrb[74].mxu1 %v1050_v8  ;;  %1857 = vmatmul.mubr.f32.gmra.mrb[106].mxu0 %v1016_v49  ;;  %v4017_v30 = vpop.permute.xlu0 %1234 }
 0x1bc   :  { %2362 = vmatprep.mubr.msk.f32.mxu0 %vm1282_vm2, %v1021_v51  ;;  %2365 = vmatprep.mubr.msk.f32.mxu1 %vm1282_vm2, %v1033_v52  ;;  %v4019_v31 = vpop.permute.xlu1 %1239 }
 0x1bf   :  { %1862 = vmatmul.mubr.f32.gmra.mrb[108].mxu0 %v1020_v53  ;;  %1877 = vmatmul.mubr.f32.vlgmr.msra.gmra.mrb[64].mxu1 %v1032_v56  ;;  %v4021_v37 = vpop.permute.xlu0 %1244 }
 0x1c0   :  { %2363 = vmatprep.mubr.msk.f32.mxu0 %vm1282_vm2, %v1025_v57  ;;  %2366 = vmatprep.mubr.msk.f32.mxu1 %vm1282_vm2, %v1037_v38  ;;  %v4023_v33 = vpop.permute.xlu1 %1249 }
 0x1c3   :  { %1867 = vmatmul.mubr.f32.gmra.mrb[110].mxu0 %v1024_v59  ;;  %1882 = vmatmul.mubr.f32.gmra.mrb[66].mxu1 %v1036_v61  ;;  %v4025_v32 = vpop.permute.xlu0 %1254 }
 0x1c4   :  { %2364 = vmatprep.mubr.msk.f32.mxu0 %vm1282_vm2, %v1029_v18  ;;  %2367 = vmatprep.mubr.msk.f32.mxu1 %vm1282_vm2, %v1041_v43  ;;  %v4027_v49 = vpop.permute.xlu1 %1259 }
 0x1c7   :  { %1872 = vmatmul.mubr.f32.gmra.mrb[112].mxu0 %v1028_v1  ;;  %1887 = vmatmul.mubr.f32.gmra.mrb[68].mxu1 %v1040_v42  ;;  %v4031_v53 = vpop.permute.xlu0 %1264 }
 0x1c8   :  { %2368 = vmatprep.mubr.msk.f32.mxu1 %vm1282_vm2, %v1045_v45  ;;  %v4035_v57 = vpop.permute.xlu1 %1269 }
 0x1c9   :  { %4173 = vst [vmem:[#allocation6_spill] sm:$0xff] %v4035_v57 }
 0x1cb   :  { %1892 = vmatmul.mubr.f32.gmra.mrb[70].mxu1 %v1044_v3  ;;  %v4039_v61 = vpop.permute.xlu0 %1274 }
 0x1cc   :  { %2369 = vmatprep.mubr.msk.f32.mxu1 %vm1282_vm2, %v1049_v4  ;;  %4174 = vst [vmem:[#allocation7_spill] sm:$0xff] %v4039_v61  ;;  %v4041_v43 = vpop.permute.xlu1 %1279 }
 0x1cd   :  { %4175 = vst [vmem:[#allocation8_spill] sm:$0xff] %v4041_v43 }
 0x1cf   :  { %1897 = vmatmul.mubr.f32.gmra.mrb[72].mxu1 %v1048_v6 }
 0x1d0   :  { %2370 = vmatprep.mubr.msk.f32.mxu1 %vm1282_vm2, %v1053_v7  ;;  %v1986_v7 = vpop.permute.xlu0 %1985 }
 0x1d3   :  { %1902 = vmatmul.mubr.f32.gmra.mrb[74].mxu1 %v1052_v9 }
 0x1fa   :  { %v1463_v22 = vpop.f32.mrb[0].mxu1 }
 0x1fb   :  { %v1465_v23 = vpop.f32.mrb[1].mxu1  ;;  %v1464_v1 = vadd.f32 %v1463_v22, %v3865_v26 }
 0x1fe   :  { %v1468_v55 = vpop.f32.mrb[2].mxu1 }
 0x1ff   :  { %v1470_v29 = vpop.f32.mrb[3].mxu1  ;;  %v1469_v9 = vadd.f32 %v1468_v55, %v3874_v35  ;;  %v1996_v35 = vpop.permute.xlu0 %1995 }
 0x202   :  { %v1473_v27 = vpop.f32.mrb[4].mxu1 }
 0x203   :  { %v1475_v54 = vpop.f32.mrb[5].mxu1 }
 0x206   :  { %v1478_v34 = vpop.f32.mrb[6].mxu1 }
 0x207   :  { %v1480_v60 = vpop.f32.mrb[7].mxu1  ;;  %v1479_v55 = vadd.f32 %v1478_v34, %v3897_v47 }
 0x20a   :  { %v1483_v39 = vpop.f32.mrb[8].mxu1 }
 0x20b   :  { %v1485_v58 = vpop.f32.mrb[9].mxu1  ;;  %v1484_v57 = vadd.f32 %v1483_v39, %v3912_v5 }
 0x20e   :  { %v1488_v46 = vpop.f32.mrb[10].mxu1 }
 0x20f   :  { %v1490_v8 = vpop.f32.mrb[11].mxu1 }
 0x212   :  { %v4029_v51 = vpop.f32.mrb[12].mxu1 }
 0x213   :  { %v1495_v52 = vpop.f32.mrb[13].mxu1 }
 0x214   :  { %v1991_v52 = vpop.permute.xlu1 %1990 }
 0x216   :  { %v4033_v56 = vpop.f32.mrb[14].mxu1 }
 0x217   :  { %v1500_v38 = vpop.f32.mrb[15].mxu1 }
 0x218   :  { %v1474_v38 = vadd.f32 %v1473_v27, %v3889_v41 }
 0x21a   :  { %v4037_v59 = vpop.f32.mrb[16].mxu1 }
 0x21b   :  { %v1505_v18 = vpop.f32.mrb[17].mxu1 }
 0x21e   :  { %v4044_v42 = vpop.f32.mrb[18].mxu1  ;;  %v1718_v45 = vpop.f32.mrb[50].mxu0 }
 0x21f   :  { %v1719_v3 = vadd.f32 %v1718_v45, %v1464_v1  ;;  %v1510_v4 = vpop.f32.mrb[19].mxu1  ;;  %v1720_v6 = vpop.f32.mrb[51].mxu0 }
 0x221   :  { %v1907_v54 = vmax.f32 %v1719_v3, 0.0 }
 0x222   :  { %v4047_v23 = vpop.f32.mrb[20].mxu1  ;;  %v1723_v29 = vpop.f32.mrb[52].mxu0 }
 0x223   :  { %v1724_v60 = vadd.f32 %v1723_v29, %v1469_v9  ;;  %v1515_v58 = vpop.f32.mrb[21].mxu1  ;;  %v1725_v8 = vpop.f32.mrb[53].mxu0  ;;  %v2173_v1 = vmul.f32 %v1986_v7, %v1907_v54 }
 0x225   :  { %v1908_v26 = vmax.f32 %v1724_v60, 0.0  ;;  %v2001_v60 = vpop.permute.xlu1 %2000 }
 0x226   :  { %v4050_v22 = vpop.f32.mrb[22].mxu1  ;;  %v1728_v18 = vpop.f32.mrb[54].mxu0 }
 0x227   :  { %v2174_v45 = vmul.f32 %v1991_v52, %v1908_v26  ;;  %v1729_v4 = vadd.f32 %v1728_v18, %v1474_v38  ;;  %v1520_v6 = vpop.f32.mrb[23].mxu1  ;;  %v1730_v43 = vpop.f32.mrb[55].mxu0 }
 0x228   :  { %v2006_v18 = vpop.permute.xlu0 %2005 }
 0x229   :  { %v2211_v61 = vadd.f32 %v2174_v45, %v2173_v1  ;;  %v1909_v3 = vmax.f32 %v1729_v4, 0.0  ;;  %v1489_v1 = vadd.f32 %v1488_v46, %v3922_v24 }
 0x22a   :  { %v4053_v9 = vpop.f32.mrb[24].mxu1  ;;  %v1733_v29 = vpop.f32.mrb[56].mxu0 }
 0x22b   :  { %v2175_v58 = vmul.f32 %v1996_v35, %v1909_v3  ;;  %v1734_v8 = vadd.f32 %v1733_v29, %v1479_v55  ;;  %v1525_v41 = vpop.f32.mrb[25].mxu1  ;;  %v1735_v27 = vpop.f32.mrb[57].mxu0  ;;  %v1494_v29 = vadd.f32 %v4029_v51, %v3938_v62 }
 0x22d   :  { %v2212_v7 = vadd.f32 %v2211_v61, %v2175_v58  ;;  %v1910_v54 = vmax.f32 %v1734_v8, 0.0  ;;  %v2011_v61 = vpop.permute.xlu1 %2010 }
 0x22e   :  { %v4056_v52 = vpop.f32.mrb[26].mxu1  ;;  %v1738_v43 = vpop.f32.mrb[58].mxu0 }
 0x22f   :  { %v2176_v38 = vmul.f32 %v2001_v60, %v1910_v54  ;;  %v1739_v26 = vadd.f32 %v1738_v43, %v1484_v57  ;;  %v1530_v47 = vpop.f32.mrb[27].mxu1  ;;  %v1740_v34 = vpop.f32.mrb[59].mxu0  ;;  %v1499_v54 = vadd.f32 %v4033_v56, %v3946_v63 }
 0x231   :  { %v2213_v45 = vadd.f32 %v2212_v7, %v2176_v38  ;;  %v1911_v4 = vmax.f32 %v1739_v26, 0.0  ;;  %v2016_v7 = vpop.permute.xlu0 %2015 }
 0x232   :  { %v4059_v6 = vpop.f32.mrb[28].mxu1  ;;  %v1743_v35 = vpop.f32.mrb[60].mxu0 }
 0x233   :  { %v2177_v55 = vmul.f32 %v2006_v18, %v1911_v4  ;;  %v1744_v3 = vadd.f32 %v1743_v35, %v1489_v1  ;;  %v1535_v5 = vpop.f32.mrb[29].mxu1  ;;  %v1745_v39 = vpop.f32.mrb[61].mxu0 }
 0x234   :  { %v2021_v1 = vpop.permute.xlu1 %2020 }
 0x235   :  { %v2214_v58 = vadd.f32 %v2213_v45, %v2177_v55  ;;  %v1912_v57 = vmax.f32 %v1744_v3, 0.0  ;;  %v1504_v45 = vadd.f32 %v4037_v59, %v3959_v2 }
 0x236   :  { %v4063_v8 = vpop.f32.mrb[30].mxu1  ;;  %v1748_v41 = vpop.f32.mrb[62].mxu0 }
 0x237   :  { %v2178_v27 = vmul.f32 %v2011_v61, %v1912_v57  ;;  %v1749_v24 = vadd.f32 %v1748_v41, %v1494_v29  ;;  %v1540_v46 = vpop.f32.mrb[31].mxu1  ;;  %v1750_v60 = vpop.f32.mrb[63].mxu0  ;;  %v1509_v29 = vadd.f32 %v4044_v42, %v3965_v40 }
 0x238   :  { %v2026_v61 = vpop.permute.xlu0 %2025  ;;  %v2031_v60 = vpop.permute.xlu1 %2030 }
 0x239   :  { %v2215_v43 = vadd.f32 %v2214_v58, %v2178_v27  ;;  %v1913_v38 = vmax.f32 %v1749_v24, 0.0 }
 0x23a   :  { %v4067_v26 = vpop.f32.mrb[32].mxu1  ;;  %v1753_v47 = vpop.f32.mrb[64].mxu0 }
 0x23b   :  { %v2179_v34 = vmul.f32 %v2016_v7, %v1913_v38  ;;  %v1754_v62 = vadd.f32 %v1753_v47, %v1499_v54  ;;  %v1545_v51 = vpop.f32.mrb[33].mxu1  ;;  %v1755_v18 = vpop.f32.mrb[65].mxu0  ;;  %v1514_v7 = vadd.f32 %v4047_v23, %v3974_v44 }
 0x23c   :  { %v2036_v51 = vpop.permute.xlu0 %2035  ;;  %v1519_v18 = vadd.f32 %v4050_v22, %v3979_v0 }
 0x23d   :  { %v2216_v4 = vadd.f32 %v2215_v43, %v2179_v34  ;;  %v1914_v35 = vmax.f32 %v1754_v62, 0.0 }
 0x23e   :  { %v4071_v55 = vpop.f32.mrb[34].mxu1  ;;  %v1758_v3 = vpop.f32.mrb[66].mxu0 }
 0x23f   :  { %v2180_v5 = vmul.f32 %v2021_v1, %v1914_v35  ;;  %v1759_v63 = vadd.f32 %v1758_v3, %v1504_v45  ;;  %v1550_v56 = vpop.f32.mrb[35].mxu1  ;;  %v1760_v39 = vpop.f32.mrb[67].mxu0 }
 0x240   :  { %v1524_v56 = vadd.f32 %v4053_v9, %v3985_v10 }
 0x241   :  { %v2217_v58 = vadd.f32 %v2216_v4, %v2180_v5  ;;  %v1915_v57 = vmax.f32 %v1759_v63, 0.0  ;;  %v2041_v63 = vpop.permute.xlu1 %2040 }
 0x242   :  { %v4075_v41 = vpop.f32.mrb[36].mxu1  ;;  %v1763_v27 = vpop.f32.mrb[68].mxu0 }
 0x243   :  { %v2181_v24 = vmul.f32 %v2026_v61, %v1915_v57  ;;  %v1764_v2 = vadd.f32 %v1763_v27, %v1509_v29  ;;  %v1555_v59 = vpop.f32.mrb[37].mxu1  ;;  %v1765_v46 = vpop.f32.mrb[69].mxu0 }
 0x245   :  { %v2218_v54 = vadd.f32 %v2217_v58, %v2181_v24  ;;  %v1916_v43 = vmax.f32 %v1764_v2, 0.0  ;;  %v2046_v24 = vpop.permute.xlu0 %2045  ;;  %v1529_v2 = vadd.f32 %v4056_v52, %v3987_v11 }
 0x246   :  { %v4079_v38 = vpop.f32.mrb[38].mxu1  ;;  %v1768_v47 = vpop.f32.mrb[70].mxu0 }
 0x247   :  { %v2182_v34 = vmul.f32 %v2031_v60, %v1916_v43  ;;  %v1769_v40 = vadd.f32 %v1768_v47, %v1514_v7  ;;  %v1560_v42 = vpop.f32.mrb[39].mxu1  ;;  %v1770_v62 = vpop.f32.mrb[71].mxu0 }
 0x248   :  { %v2051_v47 = vpop.permute.xlu1 %2050 }
 0x249   :  { %v2219_v1 = vadd.f32 %v2218_v54, %v2182_v34  ;;  %v1917_v45 = vmax.f32 %v1769_v40, 0.0  ;;  %v1534_v34 = vadd.f32 %v4059_v6, %v3989_v50 }
 0x24a   :  { %v4083_v4 = vpop.f32.mrb[40].mxu1  ;;  %v1773_v35 = vpop.f32.mrb[72].mxu0 }
 0x24b   :  { %v2183_v3 = vmul.f32 %v2036_v51, %v1917_v45  ;;  %v1774_v44 = vadd.f32 %v1773_v35, %v1519_v18  ;;  %v1565_v23 = vpop.f32.mrb[41].mxu1  ;;  %v1775_v5 = vpop.f32.mrb[73].mxu0  ;;  %v1539_v35 = vadd.f32 %v4063_v8, %v3991_v36 }
 0x24c   :  { %v2056_v45 = vpop.permute.xlu0 %2055 }
 0x24d   :  { %v2220_v39 = vadd.f32 %v2219_v1, %v2183_v3  ;;  %v1918_v61 = vmax.f32 %v1774_v44, 0.0 }
 0x24e   :  { %v4087_v29 = vpop.f32.mrb[42].mxu1  ;;  %v1778_v58 = vpop.f32.mrb[74].mxu0 }
 0x24f   :  { %v2184_v57 = vmul.f32 %v2041_v63, %v1918_v61  ;;  %v1779_v0 = vadd.f32 %v1778_v58, %v1524_v56  ;;  %v1570_v22 = vpop.f32.mrb[43].mxu1  ;;  %v1780_v27 = vpop.f32.mrb[75].mxu0  ;;  %v1544_v61 = vadd.f32 %v4067_v26, %v3993_v13 }
 0x251   :  { %v2221_v59 = vadd.f32 %v2220_v39, %v2184_v57  ;;  %v1919_v46 = vmax.f32 %v1779_v0, 0.0  ;;  %v2061_v39 = vpop.permute.xlu1 %2060 }
 0x252   :  { %v4091_v60 = vpop.f32.mrb[44].mxu1  ;;  %v1783_v7 = vpop.f32.mrb[76].mxu0 }
 0x253   :  { %v2185_v54 = vmul.f32 %v2046_v24, %v1919_v46  ;;  %v1784_v10 = vadd.f32 %v1783_v7, %v1529_v2  ;;  %v1575_v9 = vpop.f32.mrb[45].mxu1  ;;  %v1785_v43 = vpop.f32.mrb[77].mxu0 }
 0x254   :  { %v2066_v2 = vpop.permute.xlu0 %2065 }
 0x255   :  { %v2222_v40 = vadd.f32 %v2221_v59, %v2185_v54  ;;  %v1920_v42 = vmax.f32 %v1784_v10, 0.0  ;;  %v1549_v59 = vadd.f32 %v4071_v55, %v3995_v15 }
 0x256   :  { %v4095_v62 = vpop.f32.mrb[46].mxu1  ;;  %v1788_v51 = vpop.f32.mrb[78].mxu0 }
 0x257   :  { %v2186_v18 = vmul.f32 %v2051_v47, %v1920_v42  ;;  %v1789_v11 = vadd.f32 %v1788_v51, %v1534_v34  ;;  %v1580_v52 = vpop.f32.mrb[47].mxu1  ;;  %v1790_v1 = vpop.f32.mrb[79].mxu0  ;;  %v1554_v34 = vadd.f32 %v4075_v41, %v3997_v14 }
 0x258   :  { %v2071_v47 = vpop.permute.xlu1 %2070  ;;  %v2076_v1 = vpop.permute.xlu0 %2075 }
 0x259   :  { %v2223_v3 = vadd.f32 %v2222_v40, %v2186_v18  ;;  %v1921_v44 = vmax.f32 %v1789_v11, 0.0 }
 0x25a   :  { %v4099_v23 = vpop.f32.mrb[48].mxu1  ;;  %v1793_v5 = vpop.f32.mrb[80].mxu0 }
 0x25b   :  { %v2187_v63 = vmul.f32 %v2056_v45, %v1921_v44  ;;  %v1794_v50 = vadd.f32 %v1793_v5, %v1539_v35  ;;  %v1585_v6 = vpop.f32.mrb[49].mxu1  ;;  %v1795_v56 = vpop.f32.mrb[81].mxu0  ;;  %v1559_v45 = vadd.f32 %v4079_v38, %v3999_v48 }
 0x25c   :  { %v2081_v6 = vpop.permute.xlu1 %2080  ;;  %v1564_v56 = vadd.f32 %v4083_v4, %v4001_v16 }
 0x25d   :  { %v2224_v58 = vadd.f32 %v2223_v3, %v2187_v63  ;;  %v1922_v57 = vmax.f32 %v1794_v50, 0.0 }
 0x25e   :  { %v4103_v0 = vpop.f32.mrb[50].mxu1  ;;  %v1798_v22 = vpop.f32.mrb[82].mxu0 }
 0x25f   :  { %v2188_v27 = vmul.f32 %v2061_v39, %v1922_v57  ;;  %v1799_v36 = vadd.f32 %v1798_v22, %v1544_v61  ;;  %v1590_v8 = vpop.f32.mrb[51].mxu1  ;;  %v1800_v24 = vpop.f32.mrb[83].mxu0 }
 0x260   :  { %v1569_v8 = vadd.f32 %v4087_v29, %v4003_v17 }
 0x261   :  { %v2225_v46 = vadd.f32 %v2224_v58, %v2188_v27  ;;  %v1923_v7 = vmax.f32 %v1799_v36, 0.0  ;;  %v2086_v36 = vpop.permute.xlu0 %2085 }
 0x262   :  { %v4107_v54 = vpop.f32.mrb[52].mxu1  ;;  %v1803_v10 = vpop.f32.mrb[84].mxu0 }
 0x263   :  { %v2189_v9 = vmul.f32 %v2066_v2, %v1923_v7  ;;  %v1804_v13 = vadd.f32 %v1803_v10, %v1549_v59  ;;  %v1595_v26 = vpop.f32.mrb[53].mxu1  ;;  %v1805_v43 = vpop.f32.mrb[85].mxu0 }
 0x265   :  { %v2226_v40 = vadd.f32 %v2225_v46, %v2189_v9  ;;  %v1924_v42 = vmax.f32 %v1804_v13, 0.0  ;;  %v2091_v9 = vpop.permute.xlu1 %2090  ;;  %v1574_v13 = vadd.f32 %v4091_v60, %v4005_v19  ;;  %v1584_v19 = vadd.f32 %v4099_v23, %v4009_v12 }
 0x266   :  { %v4111_v51 = vpop.f32.mrb[54].mxu1  ;;  %v1808_v18 = vpop.f32.mrb[86].mxu0  ;;  %v1594_v12 = vadd.f32 %v4107_v54, %v4013_v25 }
 0x267   :  { %v2190_v11 = vmul.f32 %v2071_v47, %v1924_v42  ;;  %v1809_v15 = vadd.f32 %v1808_v18, %v1554_v34  ;;  %v1600_v55 = vpop.f32.mrb[55].mxu1  ;;  %v1810_v52 = vpop.f32.mrb[87].mxu0  ;;  %v1579_v18 = vadd.f32 %v4095_v62, %v4007_v20  ;;  %v1589_v20 = vadd.f32 %v4103_v0, %v4011_v21 }
 0x268   :  { %v2096_v55 = vpop.permute.xlu0 %2095  ;;  %v1599_v21 = vadd.f32 %v4111_v51, %v4015_v28 }
 0x269   :  { %v2227_v35 = vadd.f32 %v2226_v40, %v2190_v11  ;;  %v1925_v3 = vmax.f32 %v1809_v15, 0.0 }
 0x26a   :  { %v4115_v44 = vpop.f32.mrb[56].mxu1  ;;  %v1813_v5 = vpop.f32.mrb[88].mxu0 }
 0x26b   :  { %v2191_v63 = vmul.f32 %v2076_v1, %v1925_v3  ;;  %v1814_v14 = vadd.f32 %v1813_v5, %v1559_v45  ;;  %v1605_v41 = vpop.f32.mrb[57].mxu1  ;;  %v1815_v50 = vpop.f32.mrb[89].mxu0  ;;  %v1604_v25 = vadd.f32 %v4115_v44, %v4017_v30 }
 0x26c   :  { %v2101_v5 = vpop.permute.xlu1 %2100 }
 0x26d   :  { %v2228_v39 = vadd.f32 %v2227_v35, %v2191_v63  ;;  %v1926_v61 = vmax.f32 %v1814_v14, 0.0 }
 0x26e   :  { %v4119_v58 = vpop.f32.mrb[58].mxu1  ;;  %v1818_v57 = vpop.f32.mrb[90].mxu0 }
 0x26f   :  { %v2192_v22 = vmul.f32 %v2081_v6, %v1926_v61  ;;  %v1819_v48 = vadd.f32 %v1818_v57, %v1564_v56  ;;  %v1610_v38 = vpop.f32.mrb[59].mxu1  ;;  %v1820_v27 = vpop.f32.mrb[91].mxu0  ;;  %v1609_v28 = vadd.f32 %v4119_v58, %v4019_v31 }
 0x270   :  { %v2106_v56 = vpop.permute.xlu0 %2105 }
 0x271   :  { %v2229_v24 = vadd.f32 %v2228_v39, %v2192_v22  ;;  %v1927_v2 = vmax.f32 %v1819_v48, 0.0  ;;  %v2111_v48 = vpop.permute.xlu1 %2110 }
 0x272   :  { %v4123_v59 = vpop.f32.mrb[60].mxu1  ;;  %v1823_v46 = vpop.f32.mrb[92].mxu0 }
 0x273   :  { %v2193_v7 = vmul.f32 %v2086_v36, %v1927_v2  ;;  %v1824_v16 = vadd.f32 %v1823_v46, %v1569_v8  ;;  %v1615_v4 = vpop.f32.mrb[61].mxu1  ;;  %v1825_v10 = vpop.f32.mrb[93].mxu0  ;;  %v1614_v44 = vadd.f32 %v4123_v59, %v4021_v37 }
 0x274   :  { %v2116_v2 = vpop.permute.xlu0 %2115 }
 0x275   :  { %v2230_v26 = vadd.f32 %v2229_v24, %v2193_v7  ;;  %v1928_v43 = vmax.f32 %v1824_v16, 0.0  ;;  %v2121_v16 = vpop.permute.xlu1 %2120 }
 0x276   :  { %v4127_v47 = vpop.f32.mrb[62].mxu1  ;;  %v1828_v34 = vpop.f32.mrb[94].mxu0 }
 0x277   :  { %v2194_v40 = vmul.f32 %v2091_v9, %v1928_v43  ;;  %v1829_v17 = vadd.f32 %v1828_v34, %v1574_v13  ;;  %v1830_v29 = vpop.f32.mrb[95].mxu0  ;;  %v1620_v42 = vpop.f32.mrb[63].mxu1 }
 0x278   :  { %v2126_v43 = vpop.permute.xlu0 %2125 }
 0x279   :  { %v2231_v11 = vadd.f32 %v2230_v26, %v2194_v40  ;;  %v1929_v15 = vmax.f32 %v1829_v17, 0.0  ;;  %v2131_v29 = vpop.permute.xlu1 %2130 }
 0x27a   :  { %v1833_v52 = vpop.f32.mrb[96].mxu0 }
 0x27b   :  { %v2195_v1 = vmul.f32 %v2096_v55, %v1929_v15  ;;  %v1834_v45 = vadd.f32 %v1833_v52, %v1579_v18  ;;  %v1835_v35 = vpop.f32.mrb[97].mxu0 }
 0x27c   :  { %v2136_v30 = vpop.permute.xlu0 %2135 }
 0x27d   :  { %v2232_v60 = vadd.f32 %v2231_v11, %v2195_v1  ;;  %v1930_v3 = vmax.f32 %v1834_v45, 0.0  ;;  %v2141_v58 = vpop.permute.xlu1 %2140 }
 0x27e   :  { %v1838_v63 = vpop.f32.mrb[98].mxu0 }
 0x27f   :  { %v2196_v14 = vmul.f32 %v2101_v5, %v1930_v3  ;;  %v1839_v41 = vadd.f32 %v1838_v63, %v1584_v19  ;;  %v1840_v50 = vpop.f32.mrb[99].mxu0 }
 0x281   :  { %v2233_v62 = vadd.f32 %v2232_v60, %v2196_v14  ;;  %v1931_v6 = vmax.f32 %v1839_v41, 0.0  ;;  %v1619_v14 = vadd.f32 %v4127_v47, %v4023_v33 }
 0x282   :  { %v1843_v39 = vpop.f32.mrb[100].mxu0 }
 0x283   :  { %v2197_v61 = vmul.f32 %v2106_v56, %v1931_v6  ;;  %v1844_v57 = vadd.f32 %v1843_v39, %v1589_v20  ;;  %v1845_v22 = vpop.f32.mrb[101].mxu0 }
 0x285   :  { %v2234_v23 = vadd.f32 %v2233_v62, %v2197_v61  ;;  %v1932_v38 = vmax.f32 %v1844_v57, 0.0  ;;  %v2146_v57 = vpop.permute.xlu0 %2145 }
 0x286   :  { %v1848_v27 = vpop.f32.mrb[102].mxu0 }
 0x287   :  { %v2198_v36 = vmul.f32 %v2111_v48, %v1932_v38  ;;  %v1849_v8 = vadd.f32 %v1848_v27, %v1594_v12  ;;  %v1850_v24 = vpop.f32.mrb[103].mxu0  ;;  %v2151_v38 = vpop.permute.xlu1 %2150 }
 0x289   :  { %v2235_v0 = vadd.f32 %v2234_v23, %v2198_v36  ;;  %v1933_v46 = vmax.f32 %v1849_v8, 0.0 }
 0x28a   :  { %v1853_v7 = vpop.f32.mrb[104].mxu0 }
 0x28b   :  { %v2199_v4 = vmul.f32 %v2116_v2, %v1933_v46  ;;  %v1854_v10 = vadd.f32 %v1853_v7, %v1599_v21  ;;  %v1855_v9 = vpop.f32.mrb[105].mxu0 }
 0x28d   :  { %v2236_v54 = vadd.f32 %v2235_v0, %v2199_v4  ;;  %v1934_v13 = vmax.f32 %v1854_v10, 0.0  ;;  %v4177_v4 = vld [vmem:[#allocation7_spill] sm:$0xff] }
 0x28e   :  { %v1858_v26 = vpop.f32.mrb[106].mxu0 }
 0x28f   :  { %v2200_v34 = vmul.f32 %v2121_v16, %v1934_v13  ;;  %v1859_v40 = vadd.f32 %v1858_v26, %v1604_v25  ;;  %v1860_v17 = vpop.f32.mrb[107].mxu0  ;;  %v2161_v25 = vpop.permute.xlu1 %2160 }
 0x291   :  { %v2237_v51 = vadd.f32 %v2236_v54, %v2200_v34  ;;  %v1935_v42 = vmax.f32 %v1859_v40, 0.0  ;;  %v4178_v40 = vld [vmem:[#allocation8_spill] sm:$0xff] }
 0x292   :  { %v1863_v18 = vpop.f32.mrb[108].mxu0  ;;  %v1878_v11 = vpop.f32.mrb[64].mxu1 }
 0x293   :  { %v2201_v15 = vmul.f32 %v2126_v43, %v1935_v42  ;;  %v1864_v55 = vadd.f32 %v1863_v18, %v1609_v28  ;;  %v1865_v52 = vpop.f32.mrb[109].mxu0  ;;  %v1880_v1 = vpop.f32.mrb[65].mxu1  ;;  %v2666_v50 = vadd.f32 %v1878_v11, %v4025_v32  ;;  %v4176_v32 = vld [vmem:[#allocation6_spill] sm:$0xff] }
 0x294   :  { %v2171_v11 = vpop.permute.xlu1 %2170  ;;  %v2262_v1 = vlaneseq }
 0x295   :  { %v2238_v45 = vadd.f32 %v2237_v51, %v2201_v15  ;;  %v1936_v35 = vmax.f32 %v1864_v55, 0.0  ;;  %v1939_v22 = vmax.f32 %v2666_v50, 0.0 }
 0x296   :  { %v1868_v19 = vpop.f32.mrb[110].mxu0  ;;  %v1883_v60 = vpop.f32.mrb[66].mxu1 }
 0x297   :  { %v2202_v3 = vmul.f32 %v2131_v29, %v1936_v35  ;;  %v1869_v5 = vadd.f32 %v1868_v19, %v1614_v44  ;;  %v1870_v63 = vpop.f32.mrb[111].mxu0  ;;  %v1885_v31 = vpop.f32.mrb[67].mxu1  ;;  %v2667_v37 = vadd.f32 %v1883_v60, %v4027_v49  ;;  %v2205_v24 = vmul.f32 %v2146_v57, %v1939_v22 }
 0x298   :  { %v2156_v49 = vpop.permute.xlu0 %2155 }
 0x299   :  { %v2239_v41 = vadd.f32 %v2238_v45, %v2202_v3  ;;  %v1937_v20 = vmax.f32 %v1869_v5, 0.0  ;;  %v1940_v47 = vmax.f32 %v2667_v37, 0.0  ;;  %v2263_v45 = vshrl.u32 %v2262_v1, 7 }
 0x29a   :  { %v1873_v62 = vpop.f32.mrb[112].mxu0  ;;  %v1888_v6 = vpop.f32.mrb[68].mxu1 }
 0x29b   :  { %v2203_v56 = vmul.f32 %v2136_v30, %v1937_v20  ;;  %v1874_v59 = vadd.f32 %v1873_v62, %v1619_v14  ;;  %v1890_v39 = vpop.f32.mrb[69].mxu1  ;;  %v1875_v61 = vpop.f32.mrb[113].mxu0  ;;  %v2668_v23 = vadd.f32 %v1888_v6, %v4031_v53  ;;  %v2206_v46 = vmul.f32 %v2151_v38, %v1940_v47 }
 0x29c   :  { %v2166_v28 = vpop.permute.xlu0 %2165  ;;  %v2264_v60 = vsub.s32 0, %v2263_v45 }
 0x29d   :  { %v2240_v48 = vadd.f32 %v2239_v41, %v2203_v56  ;;  %v1938_v12 = vmax.f32 %v1874_v59, 0.0  ;;  %v1941_v21 = vmax.f32 %v2668_v23, 0.0 }
 0x29e   :  { %v1893_v33 = vpop.f32.mrb[70].mxu1 }
 0x29f   :  { %v2204_v27 = vmul.f32 %v2141_v58, %v1938_v12  ;;  %v2669_v36 = vadd.f32 %v1893_v33, %v4176_v32  ;;  %v1895_v8 = vpop.f32.mrb[71].mxu1  ;;  %v2207_v53 = vmul.f32 %v2156_v49, %v1941_v21 }
 0x2a0   :  { %v2260_v5 = vpop.permute.xlu0 %2259 }
 0x2a1   :  { %v2241_v2 = vadd.f32 %v2240_v48, %v2204_v27  ;;  %v1942_v16 = vmax.f32 %v2669_v36, 0.0  ;;  %v2265_v31 = vrot.slane %v2260_v5, %v2264_v60 }
 0x2a2   :  { %v1898_v0 = vpop.f32.mrb[72].mxu1 }
 0x2a3   :  { %v2242_v7 = vadd.f32 %v2241_v2, %v2205_v24  ;;  %v2670_v10 = vadd.f32 %v1898_v0, %v4177_v4  ;;  %v1900_v9 = vpop.f32.mrb[73].mxu1  ;;  %v2208_v34 = vmul.f32 %v2161_v25, %v1942_v16 }
 0x2a5   :  { %v2243_v54 = vadd.f32 %v2242_v7, %v2206_v46  ;;  %v1943_v13 = vmax.f32 %v2670_v10, 0.0 }
 0x2a6   :  { %v1903_v26 = vpop.f32.mrb[74].mxu1 }
 0x2a7   :  { %v2244_v43 = vadd.f32 %v2243_v54, %v2207_v53  ;;  %v2671_v17 = vadd.f32 %v1903_v26, %v4178_v40  ;;  %v1905_v29 = vpop.f32.mrb[75].mxu1  ;;  %v2209_v42 = vmul.f32 %v2166_v28, %v1943_v13 }
 0x2a9   :  { %v2245_v51 = vadd.f32 %v2244_v43, %v2208_v34  ;;  %v1944_v18 = vmax.f32 %v2671_v17, 0.0 }
 0x2ab   :  { %v2246_v15 = vadd.f32 %v2245_v51, %v2209_v42  ;;  %v2210_v55 = vmul.f32 %v2171_v11, %v1944_v18 }
 0x2ad   :  { %v2248_v52 = vsel %vm2247_vm3, %v2210_v55, 0.0 }
 0x2ae   :  { %v2249_v30 = vadd.f32 %v2248_v52, %v2246_v15 }
 0x2b0   :  { %v2250_v44 = vrot.slane %v2249_v30, 4 }
 0x2b2   :  { %v2251_v35 = vadd.f32 %v2250_v44, %v2249_v30 }
 0x2b4   :  { %v2252_v19 = vrot.slane %v2251_v35, 2 }
 0x2b6   :  { %v2253_v3 = vadd.f32 %v2252_v19, %v2251_v35 }
 0x2b8   :  { %v2254_v63 = vrot.slane %v2253_v3, 1 }
 0x2ba   :  { %v2255_v58 = vadd.f32 %v2254_v63, %v2253_v3 }
 0x2bc   :  { %v2266_v14 = vadd.f32 %v2265_v31, %v2255_v58 }
 0x2be   :  { %2267 = vst [vmem:[#allocation3] sm:$0x1] %v2266_v14 }
 0x2bf   :  { %2700 = shalt.err (!%p2697_p4)
}
 0x2c0   :  { %s2701_s11 = scalar_lea.hbm %s4172_s7, 16 }
 0x2c1   :  { %p2702_p5 = scmp.ne.s32.totalorder %s4172_s7, %s2701_s11  ;;  %p2705_p6 = scmp.lt.u32.totalorder %s2701_s11, %s4172_s7 }
 0x2c3   :  { %p2707_p7 = pnand %p2705_p6, %p2702_p5 }
 0x2c5   :  { %2710 = shalt.err (!%p2707_p7)
}
 0x2c6   :  { %2277 = dma.vmem_to_hbm [thread:$0]  %s2275_s8, 16, %s4172_s7, [#allocation4]  }
 0x2c7   :  { %2711 = dma.done.wait [#allocation4], 16  }
 0x2c8   :  { %2712 = vsyncadd [#allocation4], 4294967280 }
 0x2c9   :  { %2281 = vsyncpa [#allocation4], 1 }

</bundles_post_ra>
